<compile_context>
chip_gen: v7x
topology: tpu7x:2x2x1
jax: 0.10.0
libtpu: 0.0.40
codegen_flags: <defaults>
</compile_context>

<pallas_src>
import functools

import jax
import jax.numpy as jnp
from jax.experimental import pallas as pl
from jax.experimental.pallas import tpu as pltpu


def _round_up(n, m):
    return -(-n // m) * m


def _pick_row_tile(mp8, tm_max=512):
    """Largest multiple-of-8 divisor of mp8 that is <= tm_max.

    mp8 must be a multiple of 8.  When possible we force >= 2 row tiles so the
    'parallel' grid axis actually spreads work over v7x's two TensorCores
    (cost on single-core v5e/v6e: ~0.35us extra per step, negligible).
    """
    assert mp8 % 8 == 0
    cap = min(tm_max, mp8)
    if mp8 >= 16:
        cap = min(cap, mp8 // 2)
    cap -= cap % 8
    cap = max(cap, 8)
    for tm in range(cap, 7, -8):
        if mp8 % tm == 0:
            return tm
    return 8


def actionness_kernel(x_ref, w1_ref, b1_ref, w2_ref, emb_ref, slab_ref,
                      *, n_cls, ce):
    """One (TM, Kpad) row tile of the fused M = B*T axis.

    x_ref   : (TM, Kpad)    bf16  im2col rows [x[t-1] | x[t] | x[t+1]] (zero padded)
    w1_ref  : (Kpad, Cemb)  bf16  conv1 (k=3) weights flattened for one matmul
    b1_ref  : (1, Cemb)     f32   conv1 bias
    w2_ref  : (Cemb, Cpad)  bf16  conv2 (k=1, no bias) weights; class lanes padded
                                   to 128 with exact zeros (invariant!)
    emb_ref : (TM, Cemb)    bf16  embeddings output
    slab_ref: (TM, Cpad)    f32   cols [0:n_cls) = cas, col n_cls = actionness

    The Cemb axis is processed in static `ce`-wide chunks so live f32
    intermediates stay O(TM*ce) instead of O(TM*Cemb); the k=1-conv partial
    products are accumulated in the VMEM-resident f32 output slab.
    """
    x = x_ref[...]                                  # (TM, Kpad) bf16, read once
    cemb = w1_ref.shape[1]
    n_chunks = cemb // ce

    slab_ref[...] = jnp.zeros_like(slab_ref)

    # Static (fully unrolled) chunk loop: 4 chunks of 512 for Cemb=2048.
    for c in range(n_chunks):
        lo, hi = c * ce, (c + 1) * ce
        # Conv1d(kernel=3, padding=1) == one im2col matmul (bf16 in, f32 acc).
        h = jnp.dot(x, w1_ref[:, lo:hi], preferred_element_type=jnp.float32)
        emb = jnp.maximum(h + b1_ref[:, lo:hi], 0.0)          # bias + ReLU in f32
        emb_bf = emb.astype(emb_ref.dtype)
        emb_ref[:, lo:hi] = emb_bf                            # bf16 writeback

        # TODO(synk): Dropout(p=0.7) is identity (eval-mode semantics);
        # training mode would need pltpu.prng_seed / pltpu.prng_random_bits.

        # Conv1d(kernel=1, no bias): accumulate this chunk's partial product.
        slab_ref[...] += jnp.dot(emb_bf, w2_ref[lo:hi, :],
                                 preferred_element_type=jnp.float32)

    # Finalize: ReLU, then pack actionness (= class-sum of cas) into the first
    # padding lane so the output stays lane-dense (128 lanes, unmasked stores).
    # Padded w2 columns are exactly zero -> ReLU gives 0 there -> the unmasked
    # row sum already equals the sum over the real class lanes.
    cas = jnp.maximum(slab_ref[...], 0.0)
    act = jnp.sum(cas, axis=1, keepdims=True)
    col = jax.lax.broadcasted_iota(jnp.int32, cas.shape, 1)
    slab_ref[...] = jnp.where(col == n_cls, act, cas).astype(slab_ref.dtype)


def _prepare_operands(x, w1_torch, b1, w2_torch, compute_dtype=jnp.bfloat16):
    """im2col + weight reshaping / padding / bf16 casting (torch Conv1d layouts in)."""
    B, T, Cin = x.shape
    Cemb = w1_torch.shape[0]
    assert w1_torch.shape == (Cemb, Cin, 3), (
        "w1 must be the raw torch Conv1d weight of shape (out_ch, in_ch, 3)")
    w2_2d = w2_torch[..., 0] if w2_torch.ndim == 3 else w2_torch   # (Ccls, Cemb)
    Ccls = w2_2d.shape[0]
    assert w2_2d.shape == (Ccls, Cemb)

    K = 3 * Cin
    Kpad = _round_up(K, 128)            # fill the 128-deep MXU contraction
    Cpad = _round_up(Ccls + 1, 128)     # class lanes + 1 spare col for actionness
    CE = min(512, Cemb)                 # in-kernel Cemb chunk width
    assert Cemb % CE == 0

    # TODO(synk): for large FEATS_DIM (e.g. 2048-d I3D features) replace this
    # wrapper im2col with a halo-tile / three-shifted-matmul scheme inside the
    # kernel; at Cin=32 the 3x-expanded copy is negligible.
    zrow = jnp.zeros((B, 1, Cin), x.dtype)
    x_m1 = jnp.concatenate([zrow, x[:, :-1, :]], axis=1)   # x[t-1]
    x_p1 = jnp.concatenate([x[:, 1:, :], zrow], axis=1)    # x[t+1]
    xcat = jnp.concatenate([x_m1, x, x_p1], axis=2)        # (B, T, 3*Cin)
    xcat = xcat.reshape(B * T, K)

    # Row tiling over the fused M = B*T axis: pad only to a multiple of 8 and
    # pick TM dividing that, so no post-kernel [:M] slice copy when 8 | B*T.
    M = B * T
    Mp = _round_up(M, 8)
    TM = _pick_row_tile(Mp)

    xcat = jnp.pad(xcat, ((0, Mp - M), (0, Kpad - K))).astype(compute_dtype)

    # torch weight (Cemb, Cin, 3) -> (3, Cin, Cemb) -> (3*Cin, Cemb), row order
    # [k=-1 taps | k=0 taps | k=+1 taps] matching the im2col column order.
    w1_mat = jnp.transpose(w1_torch, (2, 1, 0)).reshape(K, Cemb)
    w1_mat = jnp.pad(w1_mat, ((0, Kpad - K), (0, 0))).astype(compute_dtype)

    b1_row = b1.reshape(1, Cemb).astype(jnp.float32)

    # Class lanes padded with EXACT zeros (actionness packing relies on it).
    w2_mat = jnp.transpose(w2_2d, (1, 0))                    # (Cemb, Ccls)
    w2_mat = jnp.pad(w2_mat, ((0, 0), (0, Cpad - Ccls))).astype(compute_dtype)

    dims = dict(B=B, T=T, M=M, Mp=Mp, TM=TM, Kpad=Kpad,
                Cemb=Cemb, CE=CE, Ccls=Ccls, Cpad=Cpad)
    return xcat, w1_mat, b1_row, w2_mat, dims


def actionness_forward(x, w1_torch, b1, w2_torch):
    """x: (B, T, Cin) f32; torch-layout weights.

    Returns (embeddings [bf16], cas [f32], actionness [f32]).
    """
    xcat, w1m, b1r, w2m, d = _prepare_operands(x, w1_torch, b1, w2_torch)
    B, T, M, Mp, TM = d["B"], d["T"], d["M"], d["Mp"], d["TM"]
    Kpad, Cemb, CE, Ccls, Cpad = d["Kpad"], d["Cemb"], d["CE"], d["Ccls"], d["Cpad"]

    kernel = functools.partial(actionness_kernel, n_cls=Ccls, ce=CE)

    out_shape = (
        jax.ShapeDtypeStruct((Mp, Cemb), jnp.bfloat16),   # embeddings (flat rows)
        jax.ShapeDtypeStruct((Mp, Cpad), jnp.float32),    # cas slab (+ actionness col)
    )

    grid_spec = pltpu.PrefetchScalarGridSpec(
        num_scalar_prefetch=0,
        grid=(Mp // TM,),
        in_specs=[
            pl.BlockSpec((TM, Kpad), lambda i: (i, 0)),
            # Constant index maps: weights/bias are fetched once for the whole grid.
            pl.BlockSpec((Kpad, Cemb), lambda i: (0, 0)),
            pl.BlockSpec((1, Cemb), lambda i: (0, 0)),
            pl.BlockSpec((Cemb, Cpad), lambda i: (0, 0)),
        ],
        out_specs=[
            pl.BlockSpec((TM, Cemb), lambda i: (i, 0)),
            pl.BlockSpec((TM, Cpad), lambda i: (i, 0)),
        ],
    )

    emb_flat, slab_flat = pl.pallas_call(
        kernel,
        out_shape=out_shape,
        grid_spec=grid_spec,
        compiler_params=pltpu.CompilerParams(
            dimension_semantics=("parallel",),
            vmem_limit_bytes=48 * 1024 * 1024),
    )(xcat, w1m, b1r, w2m)

    if Mp != M:  # only when B*T is not a multiple of 8 (materializes a copy)
        emb_flat = emb_flat[:M]
        slab_flat = slab_flat[:M]
    emb = emb_flat.reshape(B, T, Cemb)
    slab = slab_flat.reshape(B, T, Cpad)
    cas = slab[..., :Ccls]
    actionness = slab[..., Ccls]
    return emb, cas, actionness


# ----------------------------- references ----------------------------------

def actionness_reference_f32(x, w1_torch, b1, w2_torch):
    """Pure-JAX f32 reference with the module's exact math."""
    T = x.shape[1]
    w1 = jnp.transpose(w1_torch, (2, 1, 0))                  # (3, Cin, Cemb)
    w2_2d = w2_torch[..., 0] if w2_torch.ndim == 3 else w2_torch
    xp = jnp.pad(x, ((0, 0), (1, 1), (0, 0)))
    h = (jnp.einsum('btc,cd->btd', xp[:, 0:T], w1[0])
         + jnp.einsum('btc,cd->btd', xp[:, 1:T + 1], w1[1])
         + jnp.einsum('btc,cd->btd', xp[:, 2:T + 2], w1[2])
         + b1[None, None, :])
    emb = jnp.maximum(h, 0.0)
    cas = jnp.maximum(jnp.einsum('btd,kd->btk', emb, w2_2d), 0.0)
    return emb, cas, cas.sum(-1)


def actionness_reference_matched(x, w1_torch, b1, w2_torch):
    """Reference with the same bf16-in / f32-accumulate arithmetic as the kernel."""
    xcat, w1m, b1r, w2m, d = _prepare_operands(x, w1_torch, b1, w2_torch)
    B, T, M, Ccls = d["B"], d["T"], d["M"], d["Ccls"]
    h = jnp.dot(xcat, w1m, preferred_element_type=jnp.float32)
    emb_f32 = jnp.maximum(h + b1r, 0.0)
    emb_bf = emb_f32.astype(jnp.bfloat16)
    cas_p = jnp.maximum(
        jnp.dot(emb_bf, w2m, preferred_element_type=jnp.float32), 0.0)
    emb = emb_bf[:M].reshape(B, T, -1)
    cas = cas_p[:M, :Ccls].reshape(B, T, Ccls)
    return emb, cas, cas.sum(-1)


if __name__ == "__main__":
    # Small shapes consistent with the module's forward.
    B, T = 2, 8
    len_feature = 32          # Cin (cfg.FEATS_DIM)
    embed_dim = 2048          # fixed by the module (Conv1d out_channels=2048)
    num_classes = 4           # cfg.NUM_CLASSES

    key = jax.random.PRNGKey(0)
    kx, kw1, kb1, kw2 = jax.random.split(key, 4)

    x = jax.random.normal(kx, (B, T, len_feature), dtype=jnp.float32)
    # Raw torch Conv1d layouts: weight (out_ch, in_ch, k), bias (out_ch,).
    w1_torch = 0.05 * jax.random.normal(kw1, (embed_dim, len_feature, 3), jnp.float32)
    b1 = 0.05 * jax.random.normal(kb1, (embed_dim,), jnp.float32)
    w2_torch = 0.05 * jax.random.normal(kw2, (num_classes, embed_dim, 1), jnp.float32)

    fwd = jax.jit(actionness_forward)
    emb, cas, act = fwd(x, w1_torch, b1, w2_torch)
    jax.block_until_ready((emb, cas, act))

    assert emb.shape == (B, T, embed_dim)
    assert cas.shape == (B, T, num_classes)
    assert act.shape == (B, T)

    # Check against a reference using the same bf16-in / f32-accumulate math
    # (tolerance covers ~1 bf16 ulp of rounding-boundary disagreement).
    emb_m, cas_m, act_m = actionness_reference_matched(x, w1_torch, b1, w2_torch)
    assert jnp.allclose(emb.astype(jnp.float32), emb_m.astype(jnp.float32),
                        atol=2e-2, rtol=2e-2)
    assert jnp.allclose(cas, cas_m, atol=1e-2, rtol=1e-2)
    assert jnp.allclose(act, act_m, atol=1e-2, rtol=1e-2)

    # Loose check against the full-f32 module semantics (bf16 matmul rounding).
    emb_r, cas_r, act_r = actionness_reference_f32(x, w1_torch, b1, w2_torch)
    assert jnp.allclose(emb.astype(jnp.float32), emb_r, atol=1e-1, rtol=1e-1)
    assert jnp.allclose(cas, cas_r, atol=1e-1, rtol=1e-1)
    assert jnp.allclose(act, act_r, atol=1e-1, rtol=1e-1)

    print("KERNEL_OK")
</pallas_src>

<mosaic_0001>
module attributes {stable_mosaic.version = 11 : i64} {
  func.func @actionness_kernel(%arg0: i32, %arg1: memref<8x128xbf16, #tpu.memory_space<vmem>>, %arg2: memref<128x2048xbf16, #tpu.memory_space<vmem>>, %arg3: memref<1x2048xf32, #tpu.memory_space<vmem>>, %arg4: memref<2048x128xbf16, #tpu.memory_space<vmem>>, %arg5: memref<8x2048xbf16, #tpu.memory_space<vmem>>, %arg6: memref<8x128xf32, #tpu.memory_space<vmem>>) attributes {dimension_semantics = [#tpu.dimension_semantics<parallel>], iteration_bounds = array<i64: 2>, scalar_prefetch = 0 : i64, scratch_operands = 0 : i64, tpu.core_type = #tpu.core_type<tc>, window_params = [{transform_indices = @transform_0, window_bounds = array<i64: 8, 128>}, {pipeline_mode = #tpu.pipeline_mode<synchronous>, transform_indices = @transform_1, window_bounds = array<i64: 128, 2048>}, {pipeline_mode = #tpu.pipeline_mode<synchronous>, transform_indices = @transform_2, window_bounds = array<i64: 1, 2048>}, {pipeline_mode = #tpu.pipeline_mode<synchronous>, transform_indices = @transform_3, window_bounds = array<i64: 2048, 128>}, {transform_indices = @transform_4, window_bounds = array<i64: 8, 2048>}, {transform_indices = @transform_5, window_bounds = array<i64: 8, 128>}]} {
    %c0 = arith.constant 0 : index
    %c0_0 = arith.constant 0 : index
    %0 = vector.load %arg1[%c0, %c0_0] : memref<8x128xbf16, #tpu.memory_space<vmem>>, vector<8x128xbf16>
    %cst = arith.constant 0.000000e+00 : f32
    %1 = vector.broadcast %cst : f32 to vector<8x128xf32>
    %c0_1 = arith.constant 0 : index
    %c0_2 = arith.constant 0 : index
    %2 = vector.load %arg6[%c0_1, %c0_2] : memref<8x128xf32, #tpu.memory_space<vmem>>, vector<8x128xf32>
    tpu.vector_store %arg6[%c0_1, %c0_2], %1 {strides = array<i32>} : memref<8x128xf32, #tpu.memory_space<vmem>>, vector<8x128xf32>,
    %c0_3 = arith.constant 0 : index
    %c0_4 = arith.constant 0 : index
    %3 = vector.load %arg2[%c0_3, %c0_4] : memref<128x2048xbf16, #tpu.memory_space<vmem>>, vector<128x512xbf16>
    %cst_5 = arith.constant dense<0.000000e+00> : vector<8x512xf32>
    %4 = tpu.matmul %0, %3, %cst_5 {dimension_numbers = #tpu.dot_dimension_numbers<[1], [0], [0], [1], [0, 0, 1, 1], [], []>} : vector<8x128xbf16>, vector<128x512xbf16>, vector<8x512xf32> -> vector<8x512xf32>
    %c0_6 = arith.constant 0 : index
    %c0_7 = arith.constant 0 : index
    %5 = vector.load %arg3[%c0_6, %c0_7] : memref<1x2048xf32, #tpu.memory_space<vmem>>, vector<1x512xf32>
    %6 = vector.broadcast %5 : vector<1x512xf32> to vector<8x512xf32>
    %7 = arith.addf %4, %6 : vector<8x512xf32>
    %cst_8 = arith.constant 0.000000e+00 : f32
    %8 = vector.broadcast %cst_8 : f32 to vector<8x512xf32>
    %9 = arith.maximumf %7, %8 : vector<8x512xf32>
    %10 = arith.truncf %9 : vector<8x512xf32> to vector<8x512xbf16>
    %c0_9 = arith.constant 0 : index
    %c0_10 = arith.constant 0 : index
    %11 = vector.load %arg5[%c0_9, %c0_10] : memref<8x2048xbf16, #tpu.memory_space<vmem>>, vector<8x512xbf16>
    tpu.vector_store %arg5[%c0_9, %c0_10], %10 {strides = array<i32>} : memref<8x2048xbf16, #tpu.memory_space<vmem>>, vector<8x512xbf16>,
    %c0_11 = arith.constant 0 : index
    %c0_12 = arith.constant 0 : index
    %12 = vector.load %arg6[%c0_11, %c0_12] : memref<8x128xf32, #tpu.memory_space<vmem>>, vector<8x128xf32>
    %c0_13 = arith.constant 0 : index
    %c0_14 = arith.constant 0 : index
    %13 = vector.load %arg4[%c0_13, %c0_14] : memref<2048x128xbf16, #tpu.memory_space<vmem>>, vector<512x128xbf16>
    %cst_15 = arith.constant dense<0.000000e+00> : vector<8x128xf32>
    %14 = tpu.matmul %10, %13, %cst_15 {dimension_numbers = #tpu.dot_dimension_numbers<[1], [0], [0], [1], [0, 0, 1, 1], [], []>} : vector<8x512xbf16>, vector<512x128xbf16>, vector<8x128xf32> -> vector<8x128xf32>
    %15 = arith.addf %12, %14 : vector<8x128xf32>
    %c0_16 = arith.constant 0 : index
    %c0_17 = arith.constant 0 : index
    %16 = vector.load %arg6[%c0_16, %c0_17] : memref<8x128xf32, #tpu.memory_space<vmem>>, vector<8x128xf32>
    tpu.vector_store %arg6[%c0_16, %c0_17], %15 {strides = array<i32>} : memref<8x128xf32, #tpu.memory_space<vmem>>, vector<8x128xf32>,
    %c0_18 = arith.constant 0 : index
    %c512 = arith.constant 512 : index
    %17 = vector.load %arg2[%c0_18, %c512] : memref<128x2048xbf16, #tpu.memory_space<vmem>>, vector<128x512xbf16>
    %cst_19 = arith.constant dense<0.000000e+00> : vector<8x512xf32>
    %18 = tpu.matmul %0, %17, %cst_19 {dimension_numbers = #tpu.dot_dimension_numbers<[1], [0], [0], [1], [0, 0, 1, 1], [], []>} : vector<8x128xbf16>, vector<128x512xbf16>, vector<8x512xf32> -> vector<8x512xf32>
    %c0_20 = arith.constant 0 : index
    %c512_21 = arith.constant 512 : index
    %19 = vector.load %arg3[%c0_20, %c512_21] : memref<1x2048xf32, #tpu.memory_space<vmem>>, vector<1x512xf32>
    %20 = vector.broadcast %19 : vector<1x512xf32> to vector<8x512xf32>
    %21 = arith.addf %18, %20 : vector<8x512xf32>
    %cst_22 = arith.constant 0.000000e+00 : f32
    %22 = vector.broadcast %cst_22 : f32 to vector<8x512xf32>
    %23 = arith.maximumf %21, %22 : vector<8x512xf32>
    %24 = arith.truncf %23 : vector<8x512xf32> to vector<8x512xbf16>
    %c0_23 = arith.constant 0 : index
    %c512_24 = arith.constant 512 : index
    %25 = vector.load %arg5[%c0_23, %c512_24] : memref<8x2048xbf16, #tpu.memory_space<vmem>>, vector<8x512xbf16>
    tpu.vector_store %arg5[%c0_23, %c512_24], %24 {strides = array<i32>} : memref<8x2048xbf16, #tpu.memory_space<vmem>>, vector<8x512xbf16>,
    %c0_25 = arith.constant 0 : index
    %c0_26 = arith.constant 0 : index
    %26 = vector.load %arg6[%c0_25, %c0_26] : memref<8x128xf32, #tpu.memory_space<vmem>>, vector<8x128xf32>
    %c512_27 = arith.constant 512 : index
    %c0_28 = arith.constant 0 : index
    %27 = vector.load %arg4[%c512_27, %c0_28] : memref<2048x128xbf16, #tpu.memory_space<vmem>>, vector<512x128xbf16>
    %cst_29 = arith.constant dense<0.000000e+00> : vector<8x128xf32>
    %28 = tpu.matmul %24, %27, %cst_29 {dimension_numbers = #tpu.dot_dimension_numbers<[1], [0], [0], [1], [0, 0, 1, 1], [], []>} : vector<8x512xbf16>, vector<512x128xbf16>, vector<8x128xf32> -> vector<8x128xf32>
    %29 = arith.addf %26, %28 : vector<8x128xf32>
    %c0_30 = arith.constant 0 : index
    %c0_31 = arith.constant 0 : index
    %30 = vector.load %arg6[%c0_30, %c0_31] : memref<8x128xf32, #tpu.memory_space<vmem>>, vector<8x128xf32>
    tpu.vector_store %arg6[%c0_30, %c0_31], %29 {strides = array<i32>} : memref<8x128xf32, #tpu.memory_space<vmem>>, vector<8x128xf32>,
    %c0_32 = arith.constant 0 : index
    %c1024 = arith.constant 1024 : index
    %31 = vector.load %arg2[%c0_32, %c1024] : memref<128x2048xbf16, #tpu.memory_space<vmem>>, vector<128x512xbf16>
    %cst_33 = arith.constant dense<0.000000e+00> : vector<8x512xf32>
    %32 = tpu.matmul %0, %31, %cst_33 {dimension_numbers = #tpu.dot_dimension_numbers<[1], [0], [0], [1], [0, 0, 1, 1], [], []>} : vector<8x128xbf16>, vector<128x512xbf16>, vector<8x512xf32> -> vector<8x512xf32>
    %c0_34 = arith.constant 0 : index
    %c1024_35 = arith.constant 1024 : index
    %33 = vector.load %arg3[%c0_34, %c1024_35] : memref<1x2048xf32, #tpu.memory_space<vmem>>, vector<1x512xf32>
    %34 = vector.broadcast %33 : vector<1x512xf32> to vector<8x512xf32>
    %35 = arith.addf %32, %34 : vector<8x512xf32>
    %cst_36 = arith.constant 0.000000e+00 : f32
    %36 = vector.broadcast %cst_36 : f32 to vector<8x512xf32>
    %37 = arith.maximumf %35, %36 : vector<8x512xf32>
    %38 = arith.truncf %37 : vector<8x512xf32> to vector<8x512xbf16>
    %c0_37 = arith.constant 0 : index
    %c1024_38 = arith.constant 1024 : index
    %39 = vector.load %arg5[%c0_37, %c1024_38] : memref<8x2048xbf16, #tpu.memory_space<vmem>>, vector<8x512xbf16>
    tpu.vector_store %arg5[%c0_37, %c1024_38], %38 {strides = array<i32>} : memref<8x2048xbf16, #tpu.memory_space<vmem>>, vector<8x512xbf16>,
    %c0_39 = arith.constant 0 : index
    %c0_40 = arith.constant 0 : index
    %40 = vector.load %arg6[%c0_39, %c0_40] : memref<8x128xf32, #tpu.memory_space<vmem>>, vector<8x128xf32>
    %c1024_41 = arith.constant 1024 : index
    %c0_42 = arith.constant 0 : index
    %41 = vector.load %arg4[%c1024_41, %c0_42] : memref<2048x128xbf16, #tpu.memory_space<vmem>>, vector<512x128xbf16>
    %cst_43 = arith.constant dense<0.000000e+00> : vector<8x128xf32>
    %42 = tpu.matmul %38, %41, %cst_43 {dimension_numbers = #tpu.dot_dimension_numbers<[1], [0], [0], [1], [0, 0, 1, 1], [], []>} : vector<8x512xbf16>, vector<512x128xbf16>, vector<8x128xf32> -> vector<8x128xf32>
    %43 = arith.addf %40, %42 : vector<8x128xf32>
    %c0_44 = arith.constant 0 : index
    %c0_45 = arith.constant 0 : index
    %44 = vector.load %arg6[%c0_44, %c0_45] : memref<8x128xf32, #tpu.memory_space<vmem>>, vector<8x128xf32>
    tpu.vector_store %arg6[%c0_44, %c0_45], %43 {strides = array<i32>} : memref<8x128xf32, #tpu.memory_space<vmem>>, vector<8x128xf32>,
    %c0_46 = arith.constant 0 : index
    %c1536 = arith.constant 1536 : index
    %45 = vector.load %arg2[%c0_46, %c1536] : memref<128x2048xbf16, #tpu.memory_space<vmem>>, vector<128x512xbf16>
    %cst_47 = arith.constant dense<0.000000e+00> : vector<8x512xf32>
    %46 = tpu.matmul %0, %45, %cst_47 {dimension_numbers = #tpu.dot_dimension_numbers<[1], [0], [0], [1], [0, 0, 1, 1], [], []>} : vector<8x128xbf16>, vector<128x512xbf16>, vector<8x512xf32> -> vector<8x512xf32>
    %c0_48 = arith.constant 0 : index
    %c1536_49 = arith.constant 1536 : index
    %47 = vector.load %arg3[%c0_48, %c1536_49] : memref<1x2048xf32, #tpu.memory_space<vmem>>, vector<1x512xf32>
    %48 = vector.broadcast %47 : vector<1x512xf32> to vector<8x512xf32>
    %49 = arith.addf %46, %48 : vector<8x512xf32>
    %cst_50 = arith.constant 0.000000e+00 : f32
    %50 = vector.broadcast %cst_50 : f32 to vector<8x512xf32>
    %51 = arith.maximumf %49, %50 : vector<8x512xf32>
    %52 = arith.truncf %51 : vector<8x512xf32> to vector<8x512xbf16>
    %c0_51 = arith.constant 0 : index
    %c1536_52 = arith.constant 1536 : index
    %53 = vector.load %arg5[%c0_51, %c1536_52] : memref<8x2048xbf16, #tpu.memory_space<vmem>>, vector<8x512xbf16>
    tpu.vector_store %arg5[%c0_51, %c1536_52], %52 {strides = array<i32>} : memref<8x2048xbf16, #tpu.memory_space<vmem>>, vector<8x512xbf16>,
    %c0_53 = arith.constant 0 : index
    %c0_54 = arith.constant 0 : index
    %54 = vector.load %arg6[%c0_53, %c0_54] : memref<8x128xf32, #tpu.memory_space<vmem>>, vector<8x128xf32>
    %c1536_55 = arith.constant 1536 : index
    %c0_56 = arith.constant 0 : index
    %55 = vector.load %arg4[%c1536_55, %c0_56] : memref<2048x128xbf16, #tpu.memory_space<vmem>>, vector<512x128xbf16>
    %cst_57 = arith.constant dense<0.000000e+00> : vector<8x128xf32>
    %56 = tpu.matmul %52, %55, %cst_57 {dimension_numbers = #tpu.dot_dimension_numbers<[1], [0], [0], [1], [0, 0, 1, 1], [], []>} : vector<8x512xbf16>, vector<512x128xbf16>, vector<8x128xf32> -> vector<8x128xf32>
    %57 = arith.addf %54, %56 : vector<8x128xf32>
    %c0_58 = arith.constant 0 : index
    %c0_59 = arith.constant 0 : index
    %58 = vector.load %arg6[%c0_58, %c0_59] : memref<8x128xf32, #tpu.memory_space<vmem>>, vector<8x128xf32>
    tpu.vector_store %arg6[%c0_58, %c0_59], %57 {strides = array<i32>} : memref<8x128xf32, #tpu.memory_space<vmem>>, vector<8x128xf32>,
    %c0_60 = arith.constant 0 : index
    %c0_61 = arith.constant 0 : index
    %59 = vector.load %arg6[%c0_60, %c0_61] : memref<8x128xf32, #tpu.memory_space<vmem>>, vector<8x128xf32>
    %cst_62 = arith.constant 0.000000e+00 : f32
    %60 = vector.broadcast %cst_62 : f32 to vector<8x128xf32>
    %61 = arith.maximumf %59, %60 : vector<8x128xf32>
    %cst_63 = arith.constant dense<0.000000e+00> : vector<8xf32>
    %62 = vector.multi_reduction <add>, %61, %cst_63 [1] : vector<8x128xf32> to vector<8xf32>
    %63 = vector.shape_cast %62 : vector<8xf32> to vector<8x1xf32>
    %64 = tpu.iota {dimensions = array<i32: 1>} : vector<8x128xi32>
    %c4_i32 = arith.constant 4 : i32
    %65 = vector.broadcast %c4_i32 : i32 to vector<8x128xi32>
    %66 = arith.cmpi eq, %64, %65 : vector<8x128xi32>
    %67 = vector.shape_cast %63 : vector<8x1xf32> to vector<8x1xf32>
    %68 = vector.broadcast %67 : vector<8x1xf32> to vector<8x128xf32>
    %69 = arith.select %66, %68, %61 : vector<8x128xi1>, vector<8x128xf32>
    %c0_64 = arith.constant 0 : index
    %c0_65 = arith.constant 0 : index
    %70 = vector.load %arg6[%c0_64, %c0_65] : memref<8x128xf32, #tpu.memory_space<vmem>>, vector<8x128xf32>
    tpu.vector_store %arg6[%c0_64, %c0_65], %69 {strides = array<i32>} : memref<8x128xf32, #tpu.memory_space<vmem>>, vector<8x128xf32>,
    return
  }
  func.func @transform_0(%arg0: i32) -> (i32, i32) {
    %c0_i32 = arith.constant 0 : i32
    %c0_i32_0 = arith.constant 0 : i32
    return %arg0, %c0_i32 : i32, i32
  }
  func.func @transform_1(%arg0: i32) -> (i32, i32) {
    %c0_i32 = arith.constant 0 : i32
    %c0_i32_0 = arith.constant 0 : i32
    %c0_i32_1 = arith.constant 0 : i32
    return %c0_i32, %c0_i32_0 : i32, i32
  }
  func.func @transform_2(%arg0: i32) -> (i32, i32) {
    %c0_i32 = arith.constant 0 : i32
    %c0_i32_0 = arith.constant 0 : i32
    %c0_i32_1 = arith.constant 0 : i32
    return %c0_i32, %c0_i32_0 : i32, i32
  }
  func.func @transform_3(%arg0: i32) -> (i32, i32) {
    %c0_i32 = arith.constant 0 : i32
    %c0_i32_0 = arith.constant 0 : i32
    %c0_i32_1 = arith.constant 0 : i32
    return %c0_i32, %c0_i32_0 : i32, i32
  }
  func.func @transform_4(%arg0: i32) -> (i32, i32) {
    %c0_i32 = arith.constant 0 : i32
    %c0_i32_0 = arith.constant 0 : i32
    return %arg0, %c0_i32 : i32, i32
  }
  func.func @transform_5(%arg0: i32) -> (i32, i32) {
    %c0_i32 = arith.constant 0 : i32
    %c0_i32_0 = arith.constant 0 : i32
    return %arg0, %c0_i32 : i32, i32
  }
}

</mosaic_0001>

<bundles_post_ra>
// kernel: actionness_forward.1
= control target key start
LH: loop header
LB: loop body
LE: loop exit
PB: predicated region body
PF: predicated region fallthrough
CT: control target
= control target key end

     0   :  { %11 = vsyncpa [#allocation3], 0  ;;  %s4683_s0 = inlined_call_operand.vmem [shape: bf16[16,128], index: 0, kind: input, shape index: {}]   ;;  %s4684_s1 = inlined_call_operand.vmem [shape: bf16[128,2048], index: 1, kind: input, shape index: {}]   ;;  %s4685_s2 = inlined_call_operand.vmem [shape: f32[1,2048], index: 2, kind: input, shape index: {}]   ;;  %s4686_s3 = inlined_call_operand.vmem [shape: bf16[2048,128], index: 3, kind: input, shape index: {}]   ;;  %s4687_s4 = inlined_call_operand.hbm [shape: bf16[16,2048], index: 4, kind: output, shape index: {0}]   ;;  %s4688_s5 = inlined_call_operand.vmem [shape: f32[16,128], index: 5, kind: output, shape index: {1}]  }
   0x1   :  { %13 = vsyncpa [#allocation3 + $0x1], 0  ;;  %s3703_s18 = smov 0   ;;  %s3705_s19 = smov 0  }
   0x2   :  { %s3707_s20 = smov 0   ;;  %s3709_s21 = smov 0  }
   0x3 LB: > { %s3724_s22 = sadd.s32 4294967295, %s3669_s21   ;;  %s2976_s23 = sadd.s32 4294967294, %s3669_s21   ;;  %s3669_s21 = sphi %s3709_s21, %s4694_s21   ;;  %s3665_s20 = sphi %s3707_s20, %s4693_s20   ;;  %s3661_s19 = sphi %s3705_s19, %s4692_s19   ;;  %s3657_s18 = sphi %s3703_s18, %s4691_s18  }
   0x4   : > { %s3728_s24 = sadd.s32 1, %s3669_s21   ;;  %s115_s25 = sadd.s32 1, %s3665_s20 }
   0x5   : > { %s112_s26 = ssub.s32 %s3669_s21, %s3728_s24  ;;  %p125_p0 = scmp.ne.s32.totalorder %s3665_s20, %s3661_s19 }
   0x6   : > { %p113_p1 = scmp.eq.s32.totalorder %s112_s26, 0  ;;  %p126_p2 = scmp.eq.s32.totalorder %s3724_s22, 1 }
   0x7   : > { %p131_p3 = scmp.ne.s32.totalorder %s3661_s19, %s3657_s18  ;;  %p132_p4 = scmp.eq.s32.totalorder %s2976_s23, 1 }
   0x8   : > { %s3739_s27 = scalar_select %p113_p1, %s3665_s20, %s115_s25  }
   0x9   : > { %p3741_p5 = por %p126_p2, %p125_p0  ;;  %p3745_p6 = por %p132_p4, %p131_p3 }
   0xa   : > { %p2979_p7 = scmp.ge.s32.totalorder %s3669_s21, 1  ;;  %p192_p8 = scmp.lt.s32.totalorder %s3669_s21, 3 }
   0xc   : > { %p193_p9 = pnand %p2979_p7, %p192_p8 }
   0xd   : > { %v234_v0 = vld [vmem:[%s4684_s1] sm:$0xff] (!%p193_p9)  ;;  %v235_v2 = vld [vmem:[%s4684_s1 + $0x8] sm:$0xff] (!%p193_p9)  ;;  %v3671_v8 = vmov (!%p193_p9), 0   ;;  %p223_p10 = scmp.lt.s32.totalorder (!%p193_p9), %s3724_s22, 1  ;;  %s214_s14 = sand.u32 (!%p193_p9), 1, %s3661_s19  }
   0xe   : > { %196 = sbr.rel (%p193_p9) target bundleno = 1390 (0x56e), region = 36  ;;  %v236_v1 = vld [vmem:[%s4684_s1 + $0x40] sm:$0xff] (!%p193_p9)  ;;  %v237_v4 = vld [vmem:[%s4684_s1 + $0x48] sm:$0xff] (!%p193_p9)  ;;  %480 = vmatprep.mubr.bf16.mxu0 (!%p193_p9), %v3671_v8  ;;  %521 = vmatprep.mubr.bf16.mxu1 (!%p193_p9), %v3671_v8  ;;  %s2980_s16 = sshll.u32 (!%p193_p9), %s214_s14, 6 }
   0xf   : > { %v2984_v3 = vcombine.high (!%p193_p9), %v234_v0, %v236_v1  ;;  %v2983_v5 = vcombine.low (!%p193_p9), %v234_v0, %v236_v1  ;;  %v238_v6 = vld [vmem:[%s4684_s1 + $0x80] sm:$0xff] (!%p193_p9)  ;;  %v2986_v9 = vcombine.high (!%p193_p9), %v235_v2, %v237_v4  ;;  %v2985_v10 = vcombine.low (!%p193_p9), %v235_v2, %v237_v4  ;;  %v239_v12 = vld [vmem:[%s4684_s1 + $0x88] sm:$0xff] (!%p193_p9)  ;;  %s4003_s10 = scalar_lea.vmem (!%p193_p9), [#allocation2], %s2980_s16  ;;  %s3260_s8 = sshll.u32 (!%p193_p9), %s3724_s22, 10 }
  0x10   : > { %v240_v7 = vld [vmem:[%s4684_s1 + $0xc0] sm:$0xff] (!%p193_p9)  ;;  %v241_v13 = vld [vmem:[%s4684_s1 + $0xc8] sm:$0xff] (!%p193_p9)  ;;  %s2890_s11 = sshll.u32 (!%p193_p9), %s4003_s10, 4  ;;  %s4640_s17 = scalar_lea.hbm (!%p193_p9), %s4687_s4, %s3260_s8  ;;  %s2891_s11 = int_to_ptr.vmem [resolvable:$true] %s2890_s11 }
  0x11   : > { %v2988_v11 = vcombine.high (!%p193_p9), %v238_v6, %v240_v7  ;;  %v242_v14 = vld [vmem:[%s4684_s1 + $0x100] sm:$0xff] (!%p193_p9)  ;;  %448 = vmatprep.subr.bf16.mxu0 (!%p193_p9), %v2984_v3  ;;  %v2990_v15 = vcombine.high (!%p193_p9), %v239_v12, %v241_v13  ;;  %v243_v17 = vld [vmem:[%s4684_s1 + $0x108] sm:$0xff] (!%p193_p9)  ;;  %489 = vmatprep.subr.bf16.mxu1 (!%p193_p9), %v2986_v9  ;;  %v2987_v19 = vcombine.low (!%p193_p9), %v238_v6, %v240_v7  ;;  %s2872_s23 = scalar_lea.sflag (!%p193_p9), [#allocation3], %s214_s14  ;;  %s3607_s25 = scalar_lea.vmem (!%p193_p9), %s2891_s11, 1024 }
  0x12   : > { %v244_v16 = vld [vmem:[%s4684_s1 + $0x140] sm:$0xff] (!%p193_p9)  ;;  %v245_v18 = vld [vmem:[%s4684_s1 + $0x148] sm:$0xff] (!%p193_p9)  ;;  %449 = vmatpush1.bf16.msra.mxu0 (!%p193_p9), %v2983_v5  ;;  %490 = vmatpush1.bf16.msra.mxu1 (!%p193_p9), %v2985_v10  ;;  %v2989_v20 = vcombine.low (!%p193_p9), %v239_v12, %v241_v13  ;;  %v3487_v12 = vld [vmem:[%s4686_s3 + $0xd0] sm:$0xff] (!%p193_p9)   ;;  %p3608_p11 = scmp.ne.s32.totalorder (!%p193_p9), %s2891_s11, %s3607_s25 }
  0x13   : > { %450 = vmatprep.subr.bf16.mxu0 (!%p193_p9), %v2988_v11  ;;  %v2992_v21 = vcombine.high (!%p193_p9), %v242_v14, %v244_v16  ;;  %491 = vmatprep.subr.bf16.mxu1 (!%p193_p9), %v2990_v15  ;;  %v2994_v22 = vcombine.high (!%p193_p9), %v243_v17, %v245_v18  ;;  %v246_v23 = vld [vmem:[%s4684_s1 + $0x180] sm:$0xff] (!%p193_p9)  ;;  %v247_v25 = vld [vmem:[%s4684_s1 + $0x188] sm:$0xff] (!%p193_p9)  ;;  %v2991_v27 = vcombine.low (!%p193_p9), %v242_v14, %v244_v16  ;;  %v3486_v11 = vld [vmem:[%s4686_s3 + $0x50] sm:$0xff] (!%p193_p9)  }
  0x14   : > { %v248_v24 = vld [vmem:[%s4684_s1 + $0x1c0] sm:$0xff] (!%p193_p9)  ;;  %v249_v26 = vld [vmem:[%s4684_s1 + $0x1c8] sm:$0xff] (!%p193_p9)  ;;  %v2993_v28 = vcombine.low (!%p193_p9), %v243_v17, %v245_v18  ;;  %v3488_v13 = vld [vmem:[%s4686_s3 + $0x10] sm:$0xff] (!%p193_p9)   ;;  %p3609_p12 = pnand (!%p193_p9), %p3608_p11, %p3741_p5 }
  0x15   : > { %v2996_v29 = vcombine.high %v246_v23, %v248_v24  ;;  %v2998_v30 = vcombine.high %v247_v25, %v249_v26  ;;  %v250_v31 = vld [vmem:[%s4684_s1 + $0x200] sm:$0xff]  ;;  %v251_v33 = vld [vmem:[%s4684_s1 + $0x208] sm:$0xff]  ;;  %v2995_v35 = vcombine.low %v246_v23, %v248_v24  ;;  %v2997_v37 = vcombine.low %v247_v25, %v249_v26  ;;  %s3842_s15 = scalar_select %p223_p10, %s3724_s22, 1  ;;  %v3489_v14 = vld [vmem:[%s4686_s3 + $0x90] sm:$0xff]  }
  0x16   : > { %451 = vmatpush1.bf16.msra.mxu0 %v2987_v19  ;;  %492 = vmatpush1.bf16.msra.mxu1 %v2989_v20  ;;  %v252_v32 = vld [vmem:[%s4684_s1 + $0x240] sm:$0xff]  ;;  %v253_v34 = vld [vmem:[%s4684_s1 + $0x248] sm:$0xff]  ;;  %v3490_v15 = vld [vmem:[%s4686_s3 + $0x58] sm:$0xff]   ;;  %p3610_p13 = pneg %p3609_p12 }
  0x17   : > { %452 = vmatprep.subr.bf16.mxu0 %v2992_v21  ;;  %493 = vmatprep.subr.bf16.mxu1 %v2994_v22  ;;  %v254_v36 = vld [vmem:[%s4684_s1 + $0x280] sm:$0xff]  ;;  %v3000_v38 = vcombine.high %v250_v31, %v252_v32  ;;  %v3002_v40 = vcombine.high %v251_v33, %v253_v34  ;;  %v255_v41 = vld [vmem:[%s4684_s1 + $0x288] sm:$0xff]  ;;  %v2999_v43 = vcombine.low %v250_v31, %v252_v32  ;;  %s2981_s6 = sshll.u32 %s3842_s15, 2  ;;  %v3491_v16 = vld [vmem:[%s4686_s3 + $0xd8] sm:$0xff]  }
  0x18   : > { %v256_v39 = vld [vmem:[%s4684_s1 + $0x2c0] sm:$0xff]  ;;  %v257_v42 = vld [vmem:[%s4684_s1 + $0x2c8] sm:$0xff]  ;;  %v3001_v45 = vcombine.low %v251_v33, %v253_v34  ;;  %s3857_s9 = scalar_lea.vmem %s4683_s0, %s2981_s6  ;;  %v3492_v17 = vld [vmem:[%s4686_s3 + $0x18] sm:$0xff]  }
  0x19   : > { %v258_v44 = vld [vmem:[%s4684_s1 + $0x300] sm:$0xff]  ;;  %v3004_v46 = vcombine.high %v254_v36, %v256_v39  ;;  %v3006_v48 = vcombine.high %v255_v41, %v257_v42  ;;  %v259_v49 = vld [vmem:[%s4684_s1 + $0x308] sm:$0xff]  ;;  %v3003_v51 = vcombine.low %v254_v36, %v256_v39  ;;  %v3005_v53 = vcombine.low %v255_v41, %v257_v42  ;;  %v3493_v18 = vld [vmem:[%s4686_s3 + $0x98] sm:$0xff]  }
  0x1a   : > { %453 = vmatpush1.bf16.msra.mxu0 %v2991_v27  ;;  %494 = vmatpush1.bf16.msra.mxu1 %v2993_v28  ;;  %v260_v47 = vld [vmem:[%s4684_s1 + $0x340] sm:$0xff]  ;;  %v261_v50 = vld [vmem:[%s4684_s1 + $0x348] sm:$0xff]  ;;  %v3502_v27 = vld [vmem:[%s4686_s3 + $0x70] sm:$0xff]  }
  0x1b   : > { %454 = vmatprep.subr.bf16.mxu0 %v2996_v29  ;;  %495 = vmatprep.subr.bf16.mxu1 %v2998_v30  ;;  %v262_v52 = vld [vmem:[%s4684_s1 + $0x380] sm:$0xff]  ;;  %v3008_v54 = vcombine.high %v258_v44, %v260_v47  ;;  %v3010_v56 = vcombine.high %v259_v49, %v261_v50  ;;  %v263_v57 = vld [vmem:[%s4684_s1 + $0x388] sm:$0xff]  ;;  %v3007_v59 = vcombine.low %v258_v44, %v260_v47  ;;  %v3503_v28 = vld [vmem:[%s4686_s3 + $0xf0] sm:$0xff]  }
  0x1c   : > { %v264_v55 = vld [vmem:[%s4684_s1 + $0x3c0] sm:$0xff]  ;;  %v265_v58 = vld [vmem:[%s4684_s1 + $0x3c8] sm:$0xff]  ;;  %v3009_v60 = vcombine.low %v259_v49, %v261_v50  ;;  %v3504_v29 = vld [vmem:[%s4686_s3 + $0x30] sm:$0xff]  }
  0x1d   : > { %v3012_v61 = vcombine.high %v262_v52, %v264_v55  ;;  %v3014_v62 = vcombine.high %v263_v57, %v265_v58  ;;  %v3011_v63 = vcombine.low %v262_v52, %v264_v55  ;;  %v3478_v0 = vld [vmem:[%s4686_s3 + $0x40] sm:$0xff]   ;;  %v3013_v1 = vcombine.low %v263_v57, %v265_v58  ;;  %v3482_v6 = vld [vmem:[%s4686_s3 + $0x48] sm:$0xff]   ;;  %v3505_v30 = vld [vmem:[%s4686_s3 + $0xb0] sm:$0xff]  }
  0x1e   : > { %455 = vmatpush1.bf16.msra.mxu0 %v2995_v35  ;;  %496 = vmatpush1.bf16.msra.mxu1 %v2997_v37  ;;  %v3479_v2 = vld [vmem:[%s4686_s3 + $0xc0] sm:$0xff]   ;;  %v3483_v7 = vld [vmem:[%s4686_s3 + $0xc8] sm:$0xff]   ;;  %v3506_v31 = vld [vmem:[%s4686_s3 + $0x78] sm:$0xff]  }
  0x1f   : > { %456 = vmatprep.subr.bf16.mxu0 %v3000_v38  ;;  %497 = vmatprep.subr.bf16.mxu1 %v3002_v40  ;;  %v3866_v3 = vld [vmem:[%s3857_s9] sm:$0xf]  ;;  %v3484_v9 = vld [vmem:[%s4686_s3 + $0x8] sm:$0xff]   ;;  %v3507_v32 = vld [vmem:[%s4686_s3 + $0xf8] sm:$0xff]  }
  0x20   : > { %v3480_v4 = vld [vmem:[%s4686_s3] sm:$0xff]   ;;  %v3485_v10 = vld [vmem:[%s4686_s3 + $0x88] sm:$0xff]   ;;  %v3508_v33 = vld [vmem:[%s4686_s3 + $0x38] sm:$0xff]  }
  0x21   : > { %v3481_v5 = vld [vmem:[%s4686_s3 + $0x80] sm:$0xff]   ;;  %v3498_v23 = vld [vmem:[%s4686_s3 + $0x68] sm:$0xff]   ;;  %v3509_v34 = vld [vmem:[%s4686_s3 + $0xb8] sm:$0xff]  }
  0x22   : > { %457 = vmatpush1.bf16.msra.mxu0 %v2999_v43  ;;  %498 = vmatpush1.bf16.msra.mxu1 %v3001_v45  ;;  %v3494_v19 = vld [vmem:[%s4686_s3 + $0x60] sm:$0xff]   ;;  %v3499_v24 = vld [vmem:[%s4686_s3 + $0xe8] sm:$0xff]   ;;  %v891_v35 = vld [vmem:[%s4684_s1 + $0x10] sm:$0xff]  ;;  %v268_v43 = vlaneseq }
  0x23   : > { %458 = vmatprep.subr.bf16.mxu0 %v3004_v46  ;;  %499 = vmatprep.subr.bf16.mxu1 %v3006_v48  ;;  %v3495_v20 = vld [vmem:[%s4686_s3 + $0xe0] sm:$0xff]   ;;  %v3500_v25 = vld [vmem:[%s4686_s3 + $0x28] sm:$0xff]   ;;  %v893_v36 = vld [vmem:[%s4684_s1 + $0x50] sm:$0xff] }
  0x24   : > { %v3496_v21 = vld [vmem:[%s4686_s3 + $0x20] sm:$0xff]   ;;  %v3501_v26 = vld [vmem:[%s4686_s3 + $0xa8] sm:$0xff]   ;;  %v892_v37 = vld [vmem:[%s4684_s1 + $0x18] sm:$0xff]  ;;  %v3050_v38 = vcombine.high %v891_v35, %v893_v36  ;;  %v3049_v40 = vcombine.low %v891_v35, %v893_v36  ;;  %v269_v44 = vshrl.u32 %v268_v43, 7 }
  0x25   : > { %v3497_v22 = vld [vmem:[%s4686_s3 + $0xa0] sm:$0xff]   ;;  %v894_v39 = vld [vmem:[%s4684_s1 + $0x58] sm:$0xff]  ;;  %v907_v36 = vld [vmem:[%s4684_s1 + $0x210] sm:$0xff] }
  0x26   : > { %459 = vmatpush1.bf16.msra.mxu0 %v3003_v51  ;;  %500 = vmatpush1.bf16.msra.mxu1 %v3005_v53  ;;  %v3051_v41 = vcombine.low %v892_v37, %v894_v39  ;;  %v3052_v42 = vcombine.high %v892_v37, %v894_v39  ;;  %v3973_v45 = vsub.s32 0, %v269_v44  ;;  %v266_v46 = vld [vmem:[%s4685_s2] sm:$0xf]  ;;  %v3978_v47 = vsub.s32 2, %v269_v44  ;;  %v909_v37 = vld [vmem:[%s4684_s1 + $0x250] sm:$0xff]  ;;  %v910_v39 = vld [vmem:[%s4684_s1 + $0x258] sm:$0xff] }
  0x27   : > { %460 = vmatprep.subr.bf16.mxu0 %v3008_v54  ;;  %501 = vmatprep.subr.bf16.mxu1 %v3010_v56  ;;  %v3980_v48 = vsub.s32 1, %v269_v44  ;;  %v3982_v49 = vsub.s32 3, %v269_v44 }
  0x28   : > { %v271_v50 = vrot.slane %v266_v46, %v3973_v45  ;;  %v279_v51 = vrot.slane %v266_v46, %v3978_v47 }
  0x29   : > { %v275_v52 = vrot.slane %v266_v46, %v3980_v48  ;;  %v283_v53 = vrot.slane %v266_v46, %v3982_v49  ;;  %v911_v46 = vld [vmem:[%s4684_s1 + $0x290] sm:$0xff] }
  0x2a   : > { %461 = vmatpush1.bf16.msra.mxu0 %v3007_v59  ;;  %502 = vmatpush1.bf16.msra.mxu1 %v3009_v60 }
  0x2b   : > { %462 = vmatprep.subr.bf16.mxu0 %v3012_v61  ;;  %503 = vmatprep.subr.bf16.mxu1 %v3014_v62 }
  0x2e   : > { %463 = vmatpush1.bf16.msra.mxu0 %v3011_v63  ;;  %504 = vmatpush1.bf16.msra.mxu1 %v3013_v1 }
  0x2f   : > { %3261 = vmatprep.subr.bf16.mxu0 %v3478_v0  ;;  %3283 = vmatprep.subr.bf16.mxu1 %v3479_v2 }
  0x31   : > { %481 = vmatmul.mubr.bf16.vlgmr.msra.gmra.mrb[0].mxu0 %v3866_v3  ;;  %522 = vmatmul.mubr.bf16.vlgmr.msra.gmra.mrb[0].mxu1 %v3866_v3 }
  0x32   : > { %3262 = vmatpush3.bf16.msra.mxu0 %v3480_v4  ;;  %3284 = vmatpush3.bf16.msra.mxu1 %v3481_v5 }
  0x33   : > { %3263 = vmatprep.subr.bf16.mxu0 %v3482_v6  ;;  %3285 = vmatprep.subr.bf16.mxu1 %v3483_v7  ;;  %v895_v6 = vld [vmem:[%s4684_s1 + $0x90] sm:$0xff] }
  0x34   : > { %v897_v7 = vld [vmem:[%s4684_s1 + $0xd0] sm:$0xff] }
  0x36   : > { %3264 = vmatpush3.bf16.msra.mxu0 %v3484_v9  ;;  %3286 = vmatpush3.bf16.msra.mxu1 %v3485_v10  ;;  %v896_v10 = vld [vmem:[%s4684_s1 + $0x98] sm:$0xff] }
  0x37   : > { %3265 = vmatprep.subr.bf16.mxu0 %v3486_v11  ;;  %3287 = vmatprep.subr.bf16.mxu1 %v3487_v12  ;;  %v898_v11 = vld [vmem:[%s4684_s1 + $0xd8] sm:$0xff] }
  0x3a   : > { %3266 = vmatpush3.bf16.msra.mxu0 %v3488_v13  ;;  %3288 = vmatpush3.bf16.msra.mxu1 %v3489_v14 }
  0x3b   : > { %3267 = vmatprep.subr.bf16.mxu0 %v3490_v15  ;;  %3289 = vmatprep.subr.bf16.mxu1 %v3491_v16 }
  0x3e   : > { %3268 = vmatpush3.bf16.msra.mxu0 %v3492_v17  ;;  %3290 = vmatpush3.bf16.msra.mxu1 %v3493_v18  ;;  %v3054_v17 = vcombine.high %v895_v6, %v897_v7 }
  0x3f   : > { %3269 = vmatprep.subr.bf16.mxu0 %v3494_v19  ;;  %3291 = vmatprep.subr.bf16.mxu1 %v3495_v20  ;;  %v3056_v19 = vcombine.high %v896_v10, %v898_v11  ;;  %v899_v20 = vld [vmem:[%s4684_s1 + $0x110] sm:$0xff] }
  0x42   : > { %3270 = vmatpush3.bf16.msra.mxu0 %v3496_v21  ;;  %3292 = vmatpush3.bf16.msra.mxu1 %v3497_v22  ;;  %v901_v21 = vld [vmem:[%s4684_s1 + $0x150] sm:$0xff]  ;;  %v900_v22 = vld [vmem:[%s4684_s1 + $0x118] sm:$0xff] }
  0x43   : > { %3271 = vmatprep.subr.bf16.mxu0 %v3498_v23  ;;  %3293 = vmatprep.subr.bf16.mxu1 %v3499_v24  ;;  %v902_v23 = vld [vmem:[%s4684_s1 + $0x158] sm:$0xff]  ;;  %v3053_v24 = vcombine.low %v895_v6, %v897_v7 }
  0x46   : > { %3272 = vmatpush3.bf16.msra.mxu0 %v3500_v25  ;;  %3294 = vmatpush3.bf16.msra.mxu1 %v3501_v26  ;;  %v3055_v25 = vcombine.low %v896_v10, %v898_v11  ;;  %v3058_v26 = vcombine.high %v899_v20, %v901_v21 }
  0x47   : > { %3273 = vmatprep.subr.bf16.mxu0 %v3502_v27  ;;  %3295 = vmatprep.subr.bf16.mxu1 %v3503_v28  ;;  %v3060_v27 = vcombine.high %v900_v22, %v902_v23  ;;  %v903_v28 = vld [vmem:[%s4684_s1 + $0x190] sm:$0xff] }
  0x4a   : > { %3274 = vmatpush3.bf16.msra.mxu0 %v3504_v29  ;;  %3296 = vmatpush3.bf16.msra.mxu1 %v3505_v30  ;;  %v905_v29 = vld [vmem:[%s4684_s1 + $0x1d0] sm:$0xff]  ;;  %v904_v30 = vld [vmem:[%s4684_s1 + $0x198] sm:$0xff] }
  0x4b   : > { %3275 = vmatprep.subr.bf16.mxu0 %v3506_v31  ;;  %3297 = vmatprep.subr.bf16.mxu1 %v3507_v32  ;;  %v906_v31 = vld [vmem:[%s4684_s1 + $0x1d8] sm:$0xff]  ;;  %v3057_v32 = vcombine.low %v899_v20, %v901_v21  ;;  %v3518_v20 = vld [vmem:[%s4686_s3 + $0x150] sm:$0xff]  }
  0x4c   : > { %v3064_v35 = vcombine.high %v904_v30, %v906_v31  ;;  %v3519_v21 = vld [vmem:[%s4686_s3 + $0x1d0] sm:$0xff]  }
  0x4e   : > { %3276 = vmatpush3.bf16.msra.mxu0 %v3508_v33  ;;  %3298 = vmatpush3.bf16.msra.mxu1 %v3509_v34  ;;  %v3059_v33 = vcombine.low %v900_v22, %v902_v23  ;;  %v3062_v34 = vcombine.high %v903_v28, %v905_v29  ;;  %v3520_v22 = vld [vmem:[%s4686_s3 + $0x110] sm:$0xff]  }
  0x4f   : > { %1105 = vmatprep.subr.bf16.mxu0 %v3050_v38  ;;  %1146 = vmatprep.subr.bf16.mxu1 %v3052_v42  ;;  %v908_v38 = vld [vmem:[%s4684_s1 + $0x218] sm:$0xff]  ;;  %v3066_v42 = vcombine.high %v907_v36, %v909_v37  ;;  %v3521_v23 = vld [vmem:[%s4686_s3 + $0x190] sm:$0xff]  }
  0x50   : > { %v3068_v44 = vcombine.high %v908_v38, %v910_v39 }
 0x104   : > { %v482_v54 = vpop.f32.mrb[0].mxu0  ;;  %v523_v56 = vpop.f32.mrb[0].mxu1 }
 0x105   : > { %v483_v55 = vadd.f32 %v482_v54, %v271_v50  ;;  %v484_v57 = vpop.f32.mrb[1].mxu0  ;;  %v524_v58 = vadd.f32 %v523_v56, %v279_v51  ;;  %v525_v60 = vpop.f32.mrb[1].mxu1  ;;  %v913_v50 = vld [vmem:[%s4684_s1 + $0x2d0] sm:$0xff]  ;;  %v912_v51 = vld [vmem:[%s4684_s1 + $0x298] sm:$0xff]  ;;  %v3067_v54 = vcombine.low %v908_v38, %v910_v39 }
 0x106   : > { %v485_v59 = vadd.f32 %v484_v57, %v275_v52  ;;  %v486_v61 = vpop.f32.mrb[2].mxu0  ;;  %v526_v63 = vadd.f32 %v525_v60, %v283_v53  ;;  %v527_v0 = vpop.f32.mrb[2].mxu1  ;;  %v914_v52 = vld [vmem:[%s4684_s1 + $0x2d8] sm:$0xff]  ;;  %v3065_v53 = vcombine.low %v907_v36, %v909_v37  ;;  %v915_v57 = vld [vmem:[%s4684_s1 + $0x310] sm:$0xff] }
 0x107   : > { %v530_v62 = vmax.f32 %v483_v55, 0.0  ;;  %v487_v1 = vpop.f32.mrb[3].mxu0  ;;  %v532_v2 = vmax.f32 %v524_v58, 0.0  ;;  %v528_v5 = vpop.f32.mrb[3].mxu1  ;;  %v3070_v55 = vcombine.high %v911_v46, %v913_v50  ;;  %v3072_v56 = vcombine.high %v912_v51, %v914_v52  ;;  %v917_v58 = vld [vmem:[%s4684_s1 + $0x350] sm:$0xff]  ;;  %v918_v60 = vld [vmem:[%s4684_s1 + $0x358] sm:$0xff] }
 0x108   : > { %v531_v4 = vmax.f32 %v485_v59, 0.0  ;;  %v533_v9 = vmax.f32 %v526_v63, 0.0  ;;  %v916_v59 = vld [vmem:[%s4684_s1 + $0x318] sm:$0xff]  ;;  %v3069_v61 = vcombine.low %v911_v46, %v913_v50  ;;  %v3074_v63 = vcombine.high %v915_v57, %v917_v58  ;;  %v919_v1 = vld [vmem:[%s4684_s1 + $0x390] sm:$0xff]  ;;  %v4182_v46 = vld [vmem:[%s4684_s1 + $0x20] sm:$0xff] }
 0x109   : > { %v534_v14 = vpack.c.bf16 %v530_v62, %v530_v62  ;;  %v536_v18 = vpack.c.bf16 %v532_v2, %v532_v2  ;;  %v3076_v0 = vcombine.high %v916_v59, %v918_v60  ;;  %v922_v5 = vld [vmem:[%s4684_s1 + $0x3d8] sm:$0xff]  ;;  %v3073_v6 = vcombine.low %v915_v57, %v917_v58  ;;  %v3534_v36 = vld [vmem:[%s4686_s3 + $0x170] sm:$0xff]   ;;  %v4187_v50 = vld [vmem:[%s4684_s1 + $0x60] sm:$0xff] }
 0x10a   : > { %v535_v12 = vpack.c.bf16 %v531_v4, %v531_v4  ;;  %v3252_v13 = vpack.c.bf16 %v531_v4, %v530_v62  ;;  %v537_v15 = vpack.c.bf16 %v533_v9, %v533_v9  ;;  %v3253_v16 = vpack.c.bf16 %v533_v9, %v532_v2  ;;  %v921_v2 = vld [vmem:[%s4684_s1 + $0x3d0] sm:$0xff]  ;;  %v920_v4 = vld [vmem:[%s4684_s1 + $0x398] sm:$0xff] }
 0x10b   : > { %v3071_v62 = vcombine.low %v912_v51, %v914_v52  ;;  %v3075_v7 = vcombine.low %v916_v59, %v918_v60  ;;  %v3078_v9 = vcombine.high %v919_v1, %v921_v2  ;;  %v3080_v10 = vcombine.high %v920_v4, %v922_v5  ;;  %v3535_v37 = vld [vmem:[%s4686_s3 + $0x1f0] sm:$0xff]   ;;  %v4192_v51 = vld [vmem:[%s4684_s1 + $0x28] sm:$0xff] }
 0x10c   : > { %550 = vst [vmem:[%s4003_s10] sm:$0xff] %v3252_v13  ;;  %841 = vmatprep.mubr.bf16.mxu0 %v535_v12  ;;  %551 = vst [vmem:[%s4003_s10 + $0x8] sm:$0xff] %v3253_v16  ;;  %881 = vmatprep.mubr.bf16.mxu1 %v537_v15  ;;  %v3077_v11 = vcombine.low %v919_v1, %v921_v2  ;;  %v3079_v12 = vcombine.low %v920_v4, %v922_v5  ;;  %v3510_v13 = vld [vmem:[%s4686_s3 + $0x140] sm:$0xff]   ;;  %v3536_v38 = vld [vmem:[%s4686_s3 + $0x130] sm:$0xff]  }
 0x10d   : > { %842 = vmatmul.mubr.bf16.vlgmr.msra.gmra.mrb[4].mxu0 %v534_v14  ;;  %882 = vmatmul.mubr.bf16.vlgmr.msra.gmra.mrb[4].mxu1 %v536_v18  ;;  %v3511_v14 = vld [vmem:[%s4686_s3 + $0x1c0] sm:$0xff]   ;;  %v3516_v18 = vld [vmem:[%s4686_s3 + $0x108] sm:$0xff]   ;;  %v3537_v39 = vld [vmem:[%s4686_s3 + $0x1b0] sm:$0xff]   ;;  %v3116_v52 = vcombine.high %v4182_v46, %v4187_v50 }
 0x10e   : > { %1106 = vmatpush1.bf16.msra.mxu0 %v3049_v40  ;;  %1147 = vmatpush1.bf16.msra.mxu1 %v3051_v41  ;;  %v3061_v40 = vcombine.low %v903_v28, %v905_v29  ;;  %v3063_v41 = vcombine.low %v904_v30, %v906_v31  ;;  %v3512_v15 = vld [vmem:[%s4686_s3 + $0x100] sm:$0xff]  }
 0x10f   : > { %1107 = vmatprep.subr.bf16.mxu0 %v3054_v17  ;;  %1148 = vmatprep.subr.bf16.mxu1 %v3056_v19  ;;  %v3513_v16 = vld [vmem:[%s4686_s3 + $0x180] sm:$0xff]   ;;  %v3515_v17 = vld [vmem:[%s4686_s3 + $0x1c8] sm:$0xff]  }
 0x110   : > { %1137 = vmatprep.mubr.bf16.mxu0 %v3671_v8  ;;  %1178 = vmatprep.mubr.bf16.mxu1 %v3671_v8  ;;  %v3517_v19 = vld [vmem:[%s4686_s3 + $0x188] sm:$0xff]   ;;  %v3526_v28 = vld [vmem:[%s4686_s3 + $0x160] sm:$0xff]  }
 0x111   : > { %v3527_v29 = vld [vmem:[%s4686_s3 + $0x1e0] sm:$0xff]  }
 0x112   : > { %1108 = vmatpush1.bf16.msra.mxu0 %v3053_v24  ;;  %1149 = vmatpush1.bf16.msra.mxu1 %v3055_v25  ;;  %v3522_v24 = vld [vmem:[%s4686_s3 + $0x158] sm:$0xff]   ;;  %v3528_v30 = vld [vmem:[%s4686_s3 + $0x120] sm:$0xff]  }
 0x113   : > { %1109 = vmatprep.subr.bf16.mxu0 %v3058_v26  ;;  %1150 = vmatprep.subr.bf16.mxu1 %v3060_v27  ;;  %v3523_v25 = vld [vmem:[%s4686_s3 + $0x1d8] sm:$0xff]   ;;  %v3529_v31 = vld [vmem:[%s4686_s3 + $0x1a0] sm:$0xff]  }
 0x114   : > { %v3524_v26 = vld [vmem:[%s4686_s3 + $0x118] sm:$0xff]   ;;  %v923_v5 = vld [vmem:[%s4685_s2 + $0x4] sm:$0xf] }
 0x115   : > { %v3525_v27 = vld [vmem:[%s4686_s3 + $0x198] sm:$0xff]  }
 0x116   : > { %1110 = vmatpush1.bf16.msra.mxu0 %v3057_v32  ;;  %1151 = vmatpush1.bf16.msra.mxu1 %v3059_v33  ;;  %v3530_v32 = vld [vmem:[%s4686_s3 + $0x168] sm:$0xff]  }
 0x117   : > { %1111 = vmatprep.subr.bf16.mxu0 %v3062_v34  ;;  %1152 = vmatprep.subr.bf16.mxu1 %v3064_v35  ;;  %v3531_v33 = vld [vmem:[%s4686_s3 + $0x1e8] sm:$0xff]  }
 0x118   : > { %v3532_v34 = vld [vmem:[%s4686_s3 + $0x128] sm:$0xff]  }
 0x119   : > { %v3533_v35 = vld [vmem:[%s4686_s3 + $0x1a8] sm:$0xff]  }
 0x11a   : > { %1112 = vmatpush1.bf16.msra.mxu0 %v3061_v40  ;;  %1153 = vmatpush1.bf16.msra.mxu1 %v3063_v41  ;;  %v3538_v40 = vld [vmem:[%s4686_s3 + $0x178] sm:$0xff]  }
 0x11b   : > { %1113 = vmatprep.subr.bf16.mxu0 %v3066_v42  ;;  %1154 = vmatprep.subr.bf16.mxu1 %v3068_v44  ;;  %v3539_v41 = vld [vmem:[%s4686_s3 + $0x1f8] sm:$0xff]  }
 0x11c   : > { %v3540_v42 = vld [vmem:[%s4686_s3 + $0x138] sm:$0xff]  }
 0x11d   : > { %v3541_v44 = vld [vmem:[%s4686_s3 + $0x1b8] sm:$0xff]  }
 0x11e   : > { %1114 = vmatpush1.bf16.msra.mxu0 %v3065_v53  ;;  %1155 = vmatpush1.bf16.msra.mxu1 %v3067_v54  ;;  %v1551_v53 = vld [vmem:[%s4684_s1 + $0x68] sm:$0xff]  ;;  %v3115_v54 = vcombine.low %v4182_v46, %v4187_v50 }
 0x11f   : > { %1115 = vmatprep.subr.bf16.mxu0 %v3070_v55  ;;  %1156 = vmatprep.subr.bf16.mxu1 %v3072_v56  ;;  %v3117_v55 = vcombine.low %v4192_v51, %v1551_v53  ;;  %v3118_v56 = vcombine.high %v4192_v51, %v1551_v53  ;;  %v1560_v51 = vld [vmem:[%s4684_s1 + $0x1a0] sm:$0xff]  ;;  %v1561_v53 = vld [vmem:[%s4684_s1 + $0x1a8] sm:$0xff] }
 0x122   : > { %1116 = vmatpush1.bf16.msra.mxu0 %v3069_v61  ;;  %1157 = vmatpush1.bf16.msra.mxu1 %v3071_v62 }
 0x123   : > { %1117 = vmatprep.subr.bf16.mxu0 %v3074_v63  ;;  %1158 = vmatprep.subr.bf16.mxu1 %v3076_v0 }
 0x126   : > { %1118 = vmatpush1.bf16.msra.mxu0 %v3073_v6  ;;  %1159 = vmatpush1.bf16.msra.mxu1 %v3075_v7  ;;  %v928_v6 = vrot.slane %v923_v5, %v3973_v45  ;;  %v936_v7 = vrot.slane %v923_v5, %v3978_v47 }
 0x127   : > { %1119 = vmatprep.subr.bf16.mxu0 %v3078_v9  ;;  %1160 = vmatprep.subr.bf16.mxu1 %v3080_v10  ;;  %v932_v9 = vrot.slane %v923_v5, %v3980_v48  ;;  %v940_v10 = vrot.slane %v923_v5, %v3982_v49  ;;  %v1568_v5 = vld [vmem:[%s4684_s1 + $0x2a0] sm:$0xff] }
 0x12a   : > { %1120 = vmatpush1.bf16.msra.mxu0 %v3077_v11  ;;  %1161 = vmatpush1.bf16.msra.mxu1 %v3079_v12 }
 0x12b   : > { %3305 = vmatprep.subr.bf16.mxu0 %v3510_v13  ;;  %3327 = vmatprep.subr.bf16.mxu1 %v3511_v14 }
 0x12d   : > { %1138 = vmatmul.mubr.bf16.vlgmr.msra.gmra.mrb[8].mxu0 %v3866_v3  ;;  %1179 = vmatmul.mubr.bf16.vlgmr.msra.gmra.mrb[8].mxu1 %v3866_v3  ;;  %v3514_v3 = vld [vmem:[%s4686_s3 + $0x148] sm:$0xff]  }
 0x12e   : > { %3306 = vmatpush3.bf16.msra.mxu0 %v3512_v15  ;;  %3328 = vmatpush3.bf16.msra.mxu1 %v3513_v16 }
 0x12f   : > { %3307 = vmatprep.subr.bf16.mxu0 %v3514_v3  ;;  %3329 = vmatprep.subr.bf16.mxu1 %v3515_v17 }
 0x132   : > { %3308 = vmatpush3.bf16.msra.mxu0 %v3516_v18  ;;  %3330 = vmatpush3.bf16.msra.mxu1 %v3517_v19 }
 0x133   : > { %3309 = vmatprep.subr.bf16.mxu0 %v3518_v20  ;;  %3331 = vmatprep.subr.bf16.mxu1 %v3519_v21 }
 0x136   : > { %3310 = vmatpush3.bf16.msra.mxu0 %v3520_v22  ;;  %3332 = vmatpush3.bf16.msra.mxu1 %v3521_v23 }
 0x137   : > { %3311 = vmatprep.subr.bf16.mxu0 %v3522_v24  ;;  %3333 = vmatprep.subr.bf16.mxu1 %v3523_v25  ;;  %v1552_v25 = vld [vmem:[%s4684_s1 + $0xa0] sm:$0xff] }
 0x13a   : > { %3312 = vmatpush3.bf16.msra.mxu0 %v3524_v26  ;;  %3334 = vmatpush3.bf16.msra.mxu1 %v3525_v27  ;;  %v1554_v26 = vld [vmem:[%s4684_s1 + $0xe0] sm:$0xff] }
 0x13b   : > { %3313 = vmatprep.subr.bf16.mxu0 %v3526_v28  ;;  %3335 = vmatprep.subr.bf16.mxu1 %v3527_v29  ;;  %v1553_v28 = vld [vmem:[%s4684_s1 + $0xa8] sm:$0xff] }
 0x13c   : > { %v1555_v29 = vld [vmem:[%s4684_s1 + $0xe8] sm:$0xff] }
 0x13e   : > { %3314 = vmatpush3.bf16.msra.mxu0 %v3528_v30  ;;  %3336 = vmatpush3.bf16.msra.mxu1 %v3529_v31 }
 0x13f   : > { %3315 = vmatprep.subr.bf16.mxu0 %v3530_v32  ;;  %3337 = vmatprep.subr.bf16.mxu1 %v3531_v33 }
 0x142   : > { %3316 = vmatpush3.bf16.msra.mxu0 %v3532_v34  ;;  %3338 = vmatpush3.bf16.msra.mxu1 %v3533_v35  ;;  %v3120_v35 = vcombine.high %v1552_v25, %v1554_v26 }
 0x143   : > { %3317 = vmatprep.subr.bf16.mxu0 %v3534_v36  ;;  %3339 = vmatprep.subr.bf16.mxu1 %v3535_v37  ;;  %v3122_v37 = vcombine.high %v1553_v28, %v1555_v29 }
 0x146   : > { %3318 = vmatpush3.bf16.msra.mxu0 %v3536_v38  ;;  %3340 = vmatpush3.bf16.msra.mxu1 %v3537_v39  ;;  %v1556_v38 = vld [vmem:[%s4684_s1 + $0x120] sm:$0xff] }
 0x147   : > { %3319 = vmatprep.subr.bf16.mxu0 %v3538_v40  ;;  %3341 = vmatprep.subr.bf16.mxu1 %v3539_v41  ;;  %v1558_v39 = vld [vmem:[%s4684_s1 + $0x160] sm:$0xff]  ;;  %v1557_v40 = vld [vmem:[%s4684_s1 + $0x128] sm:$0xff] }
 0x148   : > { %v1559_v41 = vld [vmem:[%s4684_s1 + $0x168] sm:$0xff]  ;;  %v3124_v46 = vcombine.high %v1556_v38, %v1558_v39 }
 0x149   : > { %v3126_v50 = vcombine.high %v1557_v40, %v1559_v41 }
 0x14a   : > { %3320 = vmatpush3.bf16.msra.mxu0 %v3540_v42  ;;  %3342 = vmatpush3.bf16.msra.mxu1 %v3541_v44  ;;  %v3119_v42 = vcombine.low %v1552_v25, %v1554_v26  ;;  %v3121_v44 = vcombine.low %v1553_v28, %v1555_v29 }
 0x14b   : > { %1762 = vmatprep.subr.bf16.mxu0 %v3116_v52  ;;  %1803 = vmatprep.subr.bf16.mxu1 %v3118_v56  ;;  %v1562_v52 = vld [vmem:[%s4684_s1 + $0x1e0] sm:$0xff]  ;;  %v3125_v56 = vcombine.low %v1557_v40, %v1559_v41  ;;  %v3550_v40 = vld [vmem:[%s4686_s3 + $0x250] sm:$0xff]  }
 0x14c   : > { %v3551_v41 = vld [vmem:[%s4686_s3 + $0x2d0] sm:$0xff]  }
 0x1e0   : > { %v3277_v57 = vpop.f32.mrb[4].mxu0  ;;  %v3299_v58 = vpop.f32.mrb[4].mxu1 }
 0x1e1   : > { %v3278_v59 = vpop.f32.mrb[5].mxu0  ;;  %v3300_v61 = vpop.f32.mrb[5].mxu1 }
 0x1e2   : > { %v3279_v60 = vadd.f32 %v3278_v59, %v3277_v57  ;;  %v3280_v62 = vpop.f32.mrb[6].mxu0  ;;  %v3301_v63 = vadd.f32 %v3300_v61, %v3299_v58  ;;  %v3302_v0 = vpop.f32.mrb[6].mxu1  ;;  %v3128_v57 = vcombine.high %v1560_v51, %v1562_v52  ;;  %v1564_v59 = vld [vmem:[%s4684_s1 + $0x220] sm:$0xff]  ;;  %v1565_v61 = vld [vmem:[%s4684_s1 + $0x228] sm:$0xff] }
 0x1e3   : > { %v3281_v1 = vpop.f32.mrb[7].mxu0  ;;  %v3303_v2 = vpop.f32.mrb[7].mxu1  ;;  %v1567_v62 = vld [vmem:[%s4684_s1 + $0x268] sm:$0xff] }
 0x1e4   : > { %v4203_v4 = vadd.f32 %v3301_v63, %v3279_v60  ;;  %v1566_v60 = vld [vmem:[%s4684_s1 + $0x260] sm:$0xff]  ;;  %v3127_v63 = vcombine.low %v1560_v51, %v1562_v52  ;;  %v3134_v2 = vcombine.high %v1565_v61, %v1567_v62  ;;  %v3556_v51 = vld [vmem:[%s4686_s3 + $0x218] sm:$0xff]  }
 0x1e5   : > { %v3132_v1 = vcombine.high %v1564_v59, %v1566_v60  ;;  %v3557_v52 = vld [vmem:[%s4686_s3 + $0x298] sm:$0xff]  }
 0x200   : > { %v1139_v11 = vpop.f32.mrb[8].mxu0  ;;  %v1180_v13 = vpop.f32.mrb[8].mxu1 }
 0x201   : > { %v1140_v12 = vadd.f32 %v1139_v11, %v928_v6  ;;  %v1141_v14 = vpop.f32.mrb[9].mxu0  ;;  %v1181_v15 = vadd.f32 %v1180_v13, %v936_v7  ;;  %v1182_v3 = vpop.f32.mrb[9].mxu1  ;;  %v1570_v6 = vld [vmem:[%s4684_s1 + $0x2e0] sm:$0xff]  ;;  %v1569_v7 = vld [vmem:[%s4684_s1 + $0x2a8] sm:$0xff]  ;;  %v3133_v11 = vcombine.low %v1565_v61, %v1567_v62  ;;  %v3566_v61 = vld [vmem:[%s4686_s3 + $0x270] sm:$0xff]  }
 0x202   : > { %v1142_v16 = vadd.f32 %v1141_v14, %v932_v9  ;;  %v1143_v17 = vpop.f32.mrb[10].mxu0  ;;  %v1183_v19 = vadd.f32 %v1182_v3, %v940_v10  ;;  %v1184_v20 = vpop.f32.mrb[10].mxu1  ;;  %v1571_v9 = vld [vmem:[%s4684_s1 + $0x2e8] sm:$0xff]  ;;  %v3131_v10 = vcombine.low %v1564_v59, %v1566_v60  ;;  %v1572_v14 = vld [vmem:[%s4684_s1 + $0x320] sm:$0xff]  ;;  %v3567_v62 = vld [vmem:[%s4686_s3 + $0x2f0] sm:$0xff]  }
 0x203   : > { %v1187_v18 = vmax.f32 %v1140_v12, 0.0  ;;  %v1144_v21 = vpop.f32.mrb[11].mxu0  ;;  %v1189_v22 = vmax.f32 %v1181_v15, 0.0  ;;  %v1185_v24 = vpop.f32.mrb[11].mxu1  ;;  %v3136_v12 = vcombine.high %v1568_v5, %v1570_v6  ;;  %v3138_v13 = vcombine.high %v1569_v7, %v1571_v9  ;;  %v1574_v15 = vld [vmem:[%s4684_s1 + $0x360] sm:$0xff]  ;;  %v1575_v3 = vld [vmem:[%s4684_s1 + $0x368] sm:$0xff] }
 0x204   : > { %v1188_v23 = vmax.f32 %v1142_v16, 0.0  ;;  %v1190_v27 = vmax.f32 %v1183_v19, 0.0  ;;  %v1573_v16 = vld [vmem:[%s4684_s1 + $0x328] sm:$0xff]  ;;  %v3135_v17 = vcombine.low %v1568_v5, %v1570_v6  ;;  %v3140_v19 = vcombine.high %v1572_v14, %v1574_v15  ;;  %v1576_v21 = vld [vmem:[%s4684_s1 + $0x3a0] sm:$0xff]  ;;  %v3572_v5 = vld [vmem:[%s4686_s3 + $0x238] sm:$0xff]  }
 0x205   : > { %v1191_v32 = vpack.c.bf16 %v1187_v18, %v1187_v18  ;;  %v1193_v36 = vpack.c.bf16 %v1189_v22, %v1189_v22  ;;  %v3142_v20 = vcombine.high %v1573_v16, %v1575_v3  ;;  %v1579_v24 = vld [vmem:[%s4684_s1 + $0x3e8] sm:$0xff]  ;;  %v3139_v25 = vcombine.low %v1572_v14, %v1574_v15  ;;  %v3573_v6 = vld [vmem:[%s4686_s3 + $0x2b8] sm:$0xff]  }
 0x206   : > { %v1192_v30 = vpack.c.bf16 %v1188_v23, %v1188_v23  ;;  %v3254_v31 = vpack.c.bf16 %v1188_v23, %v1187_v18  ;;  %v1194_v33 = vpack.c.bf16 %v1190_v27, %v1190_v27  ;;  %v3255_v34 = vpack.c.bf16 %v1190_v27, %v1189_v22  ;;  %v1578_v22 = vld [vmem:[%s4684_s1 + $0x3e0] sm:$0xff]  ;;  %v1577_v23 = vld [vmem:[%s4684_s1 + $0x3a8] sm:$0xff] }
 0x207   : > { %v3137_v18 = vcombine.low %v1569_v7, %v1571_v9  ;;  %v3141_v26 = vcombine.low %v1573_v16, %v1575_v3  ;;  %v3144_v27 = vcombine.high %v1576_v21, %v1578_v22  ;;  %v3146_v28 = vcombine.high %v1577_v23, %v1579_v24  ;;  %v3564_v59 = vld [vmem:[%s4686_s3 + $0x228] sm:$0xff]   ;;  %v4404_v7 = vld [vmem:[%s4684_s1 + $0x30] sm:$0xff] }
 0x208   : > { %1207 = vst [vmem:[%s4003_s10 + $0x10] sm:$0xff] %v3254_v31  ;;  %1498 = vmatprep.mubr.bf16.mxu0 %v1192_v30  ;;  %1208 = vst [vmem:[%s4003_s10 + $0x18] sm:$0xff] %v3255_v34  ;;  %1538 = vmatprep.mubr.bf16.mxu1 %v1194_v33  ;;  %v3143_v29 = vcombine.low %v1576_v21, %v1578_v22  ;;  %v3145_v30 = vcombine.low %v1577_v23, %v1579_v24  ;;  %v4301_v31 = vld [vmem:[%s3857_s9] sm:$0xf]  ;;  %v3565_v60 = vld [vmem:[%s4686_s3 + $0x2a8] sm:$0xff]   ;;  %s3672_s9 = smov [#allocation2]  }
 0x209   : > { %1499 = vmatmul.mubr.bf16.vlgmr.msra.gmra.mrb[12].mxu0 %v1191_v32  ;;  %1539 = vmatmul.mubr.bf16.vlgmr.msra.gmra.mrb[12].mxu1 %v1193_v36  ;;  %v3542_v32 = vld [vmem:[%s4686_s3 + $0x240] sm:$0xff]   ;;  %v3546_v36 = vld [vmem:[%s4686_s3 + $0x248] sm:$0xff]   ;;  %v4409_v9 = vld [vmem:[%s4684_s1 + $0x70] sm:$0xff]  ;;  %s3611_s16 = sshll.u32 %s3672_s9, 4  ;;  %s3612_s16 = int_to_ptr.vmem [resolvable:$false] %s3611_s16 }
 0x20a   : > { %1763 = vmatpush1.bf16.msra.mxu0 %v3115_v54  ;;  %1804 = vmatpush1.bf16.msra.mxu1 %v3117_v55  ;;  %v1563_v54 = vld [vmem:[%s4684_s1 + $0x1e8] sm:$0xff]  ;;  %v3123_v55 = vcombine.low %v1556_v38, %v1558_v39  ;;  %v3543_v33 = vld [vmem:[%s4686_s3 + $0x2c0] sm:$0xff]   ;;  %s3613_s26 = scalar_lea.vmem %s3612_s16, 2048  ;;  %p3614_p0 = scmp.lt.s32.totalorder %s2891_s11, %s3612_s16 }
 0x20b   : > { %1764 = vmatprep.subr.bf16.mxu0 %v3120_v35  ;;  %1805 = vmatprep.subr.bf16.mxu1 %v3122_v37  ;;  %v3130_v58 = vcombine.high %v1561_v53, %v1563_v54  ;;  %v3129_v0 = vcombine.low %v1561_v53, %v1563_v54  ;;  %v3544_v34 = vld [vmem:[%s4686_s3 + $0x200] sm:$0xff]   ;;  %v3547_v37 = vld [vmem:[%s4686_s3 + $0x2c8] sm:$0xff]   ;;  %p3615_p1 = scmp.lt.s32.totalorder %s3613_s26, %s3607_s25 }
 0x20c   : > { %1794 = vmatprep.mubr.bf16.mxu0 %v3671_v8  ;;  %1835 = vmatprep.mubr.bf16.mxu1 %v3671_v8  ;;  %v3545_v35 = vld [vmem:[%s4686_s3 + $0x280] sm:$0xff]   ;;  %v3548_v38 = vld [vmem:[%s4686_s3 + $0x208] sm:$0xff]  }
 0x20d   : > { %v3549_v39 = vld [vmem:[%s4686_s3 + $0x288] sm:$0xff]   ;;  %v3558_v53 = vld [vmem:[%s4686_s3 + $0x260] sm:$0xff]   ;;  %p3616_p2 = por %p3615_p1, %p3614_p0 }
 0x20e   : > { %1765 = vmatpush1.bf16.msra.mxu0 %v3119_v42  ;;  %1806 = vmatpush1.bf16.msra.mxu1 %v3121_v44  ;;  %v3552_v42 = vld [vmem:[%s4686_s3 + $0x210] sm:$0xff]   ;;  %v3559_v54 = vld [vmem:[%s4686_s3 + $0x2e0] sm:$0xff]  }
 0x20f   : > { %1766 = vmatprep.subr.bf16.mxu0 %v3124_v46  ;;  %1807 = vmatprep.subr.bf16.mxu1 %v3126_v50  ;;  %v3553_v44 = vld [vmem:[%s4686_s3 + $0x290] sm:$0xff]   ;;  %v3554_v46 = vld [vmem:[%s4686_s3 + $0x258] sm:$0xff]   ;;  %p3617_p3 = pnand %p3616_p2, %p3610_p13 }
 0x210   : > { %v3555_v50 = vld [vmem:[%s4686_s3 + $0x2d8] sm:$0xff]  }
 0x212   : > { %1767 = vmatpush1.bf16.msra.mxu0 %v3123_v55  ;;  %1808 = vmatpush1.bf16.msra.mxu1 %v3125_v56  ;;  %v3560_v55 = vld [vmem:[%s4686_s3 + $0x220] sm:$0xff]  }
 0x213   : > { %1768 = vmatprep.subr.bf16.mxu0 %v3128_v57  ;;  %1809 = vmatprep.subr.bf16.mxu1 %v3130_v58  ;;  %v3561_v56 = vld [vmem:[%s4686_s3 + $0x2a0] sm:$0xff]   ;;  %v3562_v57 = vld [vmem:[%s4686_s3 + $0x268] sm:$0xff]  }
 0x214   : > { %v3563_v58 = vld [vmem:[%s4686_s3 + $0x2e8] sm:$0xff]  }
 0x216   : > { %1769 = vmatpush1.bf16.msra.mxu0 %v3127_v63  ;;  %1810 = vmatpush1.bf16.msra.mxu1 %v3129_v0  ;;  %v3568_v63 = vld [vmem:[%s4686_s3 + $0x230] sm:$0xff]  }
 0x217   : > { %1770 = vmatprep.subr.bf16.mxu0 %v3132_v1  ;;  %1811 = vmatprep.subr.bf16.mxu1 %v3134_v2  ;;  %v3569_v0 = vld [vmem:[%s4686_s3 + $0x2b0] sm:$0xff]   ;;  %v3570_v1 = vld [vmem:[%s4686_s3 + $0x278] sm:$0xff]  }
 0x218   : > { %v3571_v2 = vld [vmem:[%s4686_s3 + $0x2f8] sm:$0xff]  }
 0x21a   : > { %1771 = vmatpush1.bf16.msra.mxu0 %v3131_v10  ;;  %1812 = vmatpush1.bf16.msra.mxu1 %v3133_v11  ;;  %v4414_v10 = vld [vmem:[%s4684_s1 + $0x38] sm:$0xff]  ;;  %v3182_v11 = vcombine.high %v4404_v7, %v4409_v9 }
 0x21b   : > { %1772 = vmatprep.subr.bf16.mxu0 %v3136_v12  ;;  %1813 = vmatprep.subr.bf16.mxu1 %v3138_v13  ;;  %v4421_v12 = vld [vmem:[%s4684_s1 + $0x78] sm:$0xff]  ;;  %v3181_v13 = vcombine.low %v4404_v7, %v4409_v9 }
 0x21c   : > { %v3183_v14 = vcombine.low %v4414_v10, %v4421_v12  ;;  %v3184_v15 = vcombine.high %v4414_v10, %v4421_v12  ;;  %v2217_v12 = vld [vmem:[%s4684_s1 + $0x1b0] sm:$0xff] }
 0x21e   : > { %1773 = vmatpush1.bf16.msra.mxu0 %v3135_v17  ;;  %1814 = vmatpush1.bf16.msra.mxu1 %v3137_v18 }
 0x21f   : > { %1774 = vmatprep.subr.bf16.mxu0 %v3140_v19  ;;  %1815 = vmatprep.subr.bf16.mxu1 %v3142_v20 }
 0x222   : > { %1775 = vmatpush1.bf16.msra.mxu0 %v3139_v25  ;;  %1816 = vmatpush1.bf16.msra.mxu1 %v3141_v26 }
 0x223   : > { %1776 = vmatprep.subr.bf16.mxu0 %v3144_v27  ;;  %1817 = vmatprep.subr.bf16.mxu1 %v3146_v28  ;;  %v1580_v27 = vld [vmem:[%s4685_s2 + $0x8] sm:$0xf] }
 0x224   : > { %v1585_v28 = vrot.slane %v1580_v27, %v3973_v45 }
 0x226   : > { %1777 = vmatpush1.bf16.msra.mxu0 %v3143_v29  ;;  %1818 = vmatpush1.bf16.msra.mxu1 %v3145_v30  ;;  %v1593_v29 = vrot.slane %v1580_v27, %v3978_v47  ;;  %v1589_v30 = vrot.slane %v1580_v27, %v3980_v48 }
 0x227   : > { %3349 = vmatprep.subr.bf16.mxu0 %v3542_v32  ;;  %3371 = vmatprep.subr.bf16.mxu1 %v3543_v33  ;;  %v1597_v32 = vrot.slane %v1580_v27, %v3982_v49  ;;  %v2225_v27 = vld [vmem:[%s4684_s1 + $0x2b0] sm:$0xff] }
 0x229   : > { %1795 = vmatmul.mubr.bf16.vlgmr.msra.gmra.mrb[16].mxu0 %v4301_v31  ;;  %1836 = vmatmul.mubr.bf16.vlgmr.msra.gmra.mrb[16].mxu1 %v4301_v31 }
 0x22a   : > { %3350 = vmatpush3.bf16.msra.mxu0 %v3544_v34  ;;  %3372 = vmatpush3.bf16.msra.mxu1 %v3545_v35 }
 0x22b   : > { %3351 = vmatprep.subr.bf16.mxu0 %v3546_v36  ;;  %3373 = vmatprep.subr.bf16.mxu1 %v3547_v37 }
 0x22e   : > { %3352 = vmatpush3.bf16.msra.mxu0 %v3548_v38  ;;  %3374 = vmatpush3.bf16.msra.mxu1 %v3549_v39 }
 0x22f   : > { %3353 = vmatprep.subr.bf16.mxu0 %v3550_v40  ;;  %3375 = vmatprep.subr.bf16.mxu1 %v3551_v41 }
 0x232   : > { %3354 = vmatpush3.bf16.msra.mxu0 %v3552_v42  ;;  %3376 = vmatpush3.bf16.msra.mxu1 %v3553_v44 }
 0x233   : > { %3355 = vmatprep.subr.bf16.mxu0 %v3554_v46  ;;  %3377 = vmatprep.subr.bf16.mxu1 %v3555_v50 }
 0x236   : > { %3356 = vmatpush3.bf16.msra.mxu0 %v3556_v51  ;;  %3378 = vmatpush3.bf16.msra.mxu1 %v3557_v52  ;;  %v2209_v52 = vld [vmem:[%s4684_s1 + $0xb0] sm:$0xff] }
 0x237   : > { %3357 = vmatprep.subr.bf16.mxu0 %v3558_v53  ;;  %3379 = vmatprep.subr.bf16.mxu1 %v3559_v54  ;;  %v2211_v53 = vld [vmem:[%s4684_s1 + $0xf0] sm:$0xff] }
 0x238   : > { %v3185_v7 = vcombine.low %v2209_v52, %v2211_v53 }
 0x23a   : > { %3358 = vmatpush3.bf16.msra.mxu0 %v3560_v55  ;;  %3380 = vmatpush3.bf16.msra.mxu1 %v3561_v56  ;;  %v2210_v55 = vld [vmem:[%s4684_s1 + $0xb8] sm:$0xff] }
 0x23b   : > { %3359 = vmatprep.subr.bf16.mxu0 %v3562_v57  ;;  %3381 = vmatprep.subr.bf16.mxu1 %v3563_v58  ;;  %v2212_v56 = vld [vmem:[%s4684_s1 + $0xf8] sm:$0xff] }
 0x23c   : > { %v3187_v9 = vcombine.low %v2210_v55, %v2212_v56 }
 0x23e   : > { %3360 = vmatpush3.bf16.msra.mxu0 %v3564_v59  ;;  %3382 = vmatpush3.bf16.msra.mxu1 %v3565_v60 }
 0x23f   : > { %3361 = vmatprep.subr.bf16.mxu0 %v3566_v61  ;;  %3383 = vmatprep.subr.bf16.mxu1 %v3567_v62  ;;  %v3186_v62 = vcombine.high %v2209_v52, %v2211_v53 }
 0x242   : > { %3362 = vmatpush3.bf16.msra.mxu0 %v3568_v63  ;;  %3384 = vmatpush3.bf16.msra.mxu1 %v3569_v0  ;;  %v3188_v0 = vcombine.high %v2210_v55, %v2212_v56 }
 0x243   : > { %3363 = vmatprep.subr.bf16.mxu0 %v3570_v1  ;;  %3385 = vmatprep.subr.bf16.mxu1 %v3571_v2  ;;  %v2213_v1 = vld [vmem:[%s4684_s1 + $0x130] sm:$0xff] }
 0x244   : > { %v2215_v2 = vld [vmem:[%s4684_s1 + $0x170] sm:$0xff] }
 0x245   : > { %v3190_v10 = vcombine.high %v2213_v1, %v2215_v2 }
 0x246   : > { %3364 = vmatpush3.bf16.msra.mxu0 %v3572_v5  ;;  %3386 = vmatpush3.bf16.msra.mxu1 %v3573_v6  ;;  %v2214_v5 = vld [vmem:[%s4684_s1 + $0x138] sm:$0xff] }
 0x247   : > { %2419 = vmatprep.subr.bf16.mxu0 %v3182_v11  ;;  %2460 = vmatprep.subr.bf16.mxu1 %v3184_v15  ;;  %v2216_v6 = vld [vmem:[%s4684_s1 + $0x178] sm:$0xff]  ;;  %v2219_v15 = vld [vmem:[%s4684_s1 + $0x1f0] sm:$0xff] }
 0x248   : > { %v3192_v11 = vcombine.high %v2214_v5, %v2216_v6 }
 0x2dc   : > { %v3321_v16 = vpop.f32.mrb[12].mxu0  ;;  %v3343_v3 = vpop.f32.mrb[12].mxu1 }
 0x2dd   : > { %v3322_v17 = vpop.f32.mrb[13].mxu0  ;;  %v3344_v19 = vpop.f32.mrb[13].mxu1 }
 0x2de   : > { %v3323_v18 = vadd.f32 %v3322_v17, %v3321_v16  ;;  %v3324_v20 = vpop.f32.mrb[14].mxu0  ;;  %v3345_v21 = vadd.f32 %v3344_v19, %v3343_v3  ;;  %v3346_v22 = vpop.f32.mrb[14].mxu1  ;;  %v3189_v16 = vcombine.low %v2213_v1, %v2215_v2  ;;  %v3191_v3 = vcombine.low %v2214_v5, %v2216_v6  ;;  %v2221_v19 = vld [vmem:[%s4684_s1 + $0x230] sm:$0xff] }
 0x2df   : > { %v3325_v23 = vpop.f32.mrb[15].mxu0  ;;  %v3347_v24 = vpop.f32.mrb[15].mxu1  ;;  %v3194_v17 = vcombine.high %v2217_v12, %v2219_v15  ;;  %v2223_v20 = vld [vmem:[%s4684_s1 + $0x270] sm:$0xff]  ;;  %v3193_v22 = vcombine.low %v2217_v12, %v2219_v15  ;;  %v3590_v12 = vld [vmem:[%s4686_s3 + $0x360] sm:$0xff]  }
 0x2e0   : > { %v1541_v25 = vadd.f32 %v3345_v21, %v3323_v18  ;;  %v2224_v21 = vld [vmem:[%s4684_s1 + $0x278] sm:$0xff]  ;;  %v3198_v24 = vcombine.high %v2221_v19, %v2223_v20  ;;  %v3582_v1 = vld [vmem:[%s4686_s3 + $0x350] sm:$0xff]   ;;  %v3591_v15 = vld [vmem:[%s4686_s3 + $0x3e0] sm:$0xff]  }
 0x2e1   : > { %v3583_v2 = vld [vmem:[%s4686_s3 + $0x3d0] sm:$0xff]  }
 0x2e2   : > { %v4430_v26 = vadd.f32 %v1541_v25, %v4203_v4  ;;  %v3584_v5 = vld [vmem:[%s4686_s3 + $0x310] sm:$0xff]  }
 0x2e3   : > { %v3585_v6 = vld [vmem:[%s4686_s3 + $0x390] sm:$0xff]  }
 0x2fc   : > { %v1796_v33 = vpop.f32.mrb[16].mxu0  ;;  %v1837_v35 = vpop.f32.mrb[16].mxu1 }
 0x2fd   : > { %v1797_v34 = vadd.f32 %v1796_v33, %v1585_v28  ;;  %v1798_v36 = vpop.f32.mrb[17].mxu0  ;;  %v1838_v37 = vadd.f32 %v1837_v35, %v1593_v29  ;;  %v1839_v4 = vpop.f32.mrb[17].mxu1  ;;  %v2227_v28 = vld [vmem:[%s4684_s1 + $0x2f0] sm:$0xff]  ;;  %v2226_v29 = vld [vmem:[%s4684_s1 + $0x2b8] sm:$0xff] }
 0x2fe   : > { %v1799_v38 = vadd.f32 %v1798_v36, %v1589_v30  ;;  %v1800_v39 = vpop.f32.mrb[18].mxu0  ;;  %v1840_v41 = vadd.f32 %v1839_v4, %v1597_v32  ;;  %v1841_v42 = vpop.f32.mrb[18].mxu1  ;;  %v2228_v30 = vld [vmem:[%s4684_s1 + $0x2f8] sm:$0xff]  ;;  %v3197_v32 = vcombine.low %v2221_v19, %v2223_v20  ;;  %v2229_v36 = vld [vmem:[%s4684_s1 + $0x330] sm:$0xff] }
 0x2ff   : > { %v1844_v40 = vmax.f32 %v1797_v34, 0.0  ;;  %v1801_v44 = vpop.f32.mrb[19].mxu0  ;;  %v1846_v46 = vmax.f32 %v1838_v37, 0.0  ;;  %v1842_v51 = vpop.f32.mrb[19].mxu1  ;;  %v3202_v34 = vcombine.high %v2225_v27, %v2227_v28  ;;  %v3204_v35 = vcombine.high %v2226_v29, %v2228_v30  ;;  %v2231_v37 = vld [vmem:[%s4684_s1 + $0x370] sm:$0xff]  ;;  %v2232_v4 = vld [vmem:[%s4684_s1 + $0x378] sm:$0xff] }
 0x300   : > { %v1845_v50 = vmax.f32 %v1799_v38, 0.0  ;;  %v1847_v54 = vmax.f32 %v1840_v41, 0.0  ;;  %v2230_v38 = vld [vmem:[%s4684_s1 + $0x338] sm:$0xff]  ;;  %v3201_v39 = vcombine.low %v2225_v27, %v2227_v28  ;;  %v3206_v41 = vcombine.high %v2229_v36, %v2231_v37  ;;  %v2233_v44 = vld [vmem:[%s4684_s1 + $0x3b0] sm:$0xff] }
 0x301   : > { %v1848_v59 = vpack.c.bf16 %v1844_v40, %v1844_v40  ;;  %v1850_v63 = vpack.c.bf16 %v1846_v46, %v1846_v46  ;;  %v3208_v42 = vcombine.high %v2230_v38, %v2232_v4  ;;  %v2236_v51 = vld [vmem:[%s4684_s1 + $0x3f8] sm:$0xff]  ;;  %v3205_v52 = vcombine.low %v2229_v36, %v2231_v37  ;;  %v3598_v19 = vld [vmem:[%s4686_s3 + $0x370] sm:$0xff]  }
 0x302   : > { %v1849_v57 = vpack.c.bf16 %v1845_v50, %v1845_v50  ;;  %v3256_v58 = vpack.c.bf16 %v1845_v50, %v1844_v40  ;;  %v1851_v60 = vpack.c.bf16 %v1847_v54, %v1847_v54  ;;  %v3257_v61 = vpack.c.bf16 %v1847_v54, %v1846_v46  ;;  %v2235_v46 = vld [vmem:[%s4684_s1 + $0x3f0] sm:$0xff]  ;;  %v2234_v50 = vld [vmem:[%s4684_s1 + $0x3b8] sm:$0xff] }
 0x303   : > { %v3203_v40 = vcombine.low %v2226_v29, %v2228_v30  ;;  %v3207_v53 = vcombine.low %v2230_v38, %v2232_v4  ;;  %v3210_v54 = vcombine.high %v2233_v44, %v2235_v46  ;;  %v3212_v55 = vcombine.high %v2234_v50, %v2236_v51  ;;  %v3599_v20 = vld [vmem:[%s4686_s3 + $0x3f0] sm:$0xff]  }
 0x304   : > { %1864 = vst [vmem:[%s4003_s10 + $0x20] sm:$0xff] %v3256_v58  ;;  %2155 = vmatprep.mubr.bf16.mxu0 %v1849_v57  ;;  %1865 = vst [vmem:[%s4003_s10 + $0x28] sm:$0xff] %v3257_v61  ;;  %2195 = vmatprep.mubr.bf16.mxu1 %v1851_v60  ;;  %v3209_v56 = vcombine.low %v2233_v44, %v2235_v46  ;;  %v3211_v57 = vcombine.low %v2234_v50, %v2236_v51  ;;  %v3574_v58 = vld [vmem:[%s4686_s3 + $0x340] sm:$0xff]  }
 0x305   : > { %2156 = vmatmul.mubr.bf16.vlgmr.msra.gmra.mrb[20].mxu0 %v1848_v59  ;;  %2196 = vmatmul.mubr.bf16.vlgmr.msra.gmra.mrb[20].mxu1 %v1850_v63  ;;  %v3575_v59 = vld [vmem:[%s4686_s3 + $0x3c0] sm:$0xff]   ;;  %v3580_v63 = vld [vmem:[%s4686_s3 + $0x308] sm:$0xff]  }
 0x306   : > { %2420 = vmatpush1.bf16.msra.mxu0 %v3181_v13  ;;  %2461 = vmatpush1.bf16.msra.mxu1 %v3183_v14  ;;  %v2218_v13 = vld [vmem:[%s4684_s1 + $0x1b8] sm:$0xff]  ;;  %v3576_v60 = vld [vmem:[%s4686_s3 + $0x300] sm:$0xff]  }
 0x307   : > { %2421 = vmatprep.subr.bf16.mxu0 %v3186_v62  ;;  %2462 = vmatprep.subr.bf16.mxu1 %v3188_v0  ;;  %v2220_v14 = vld [vmem:[%s4684_s1 + $0x1f8] sm:$0xff]  ;;  %v3577_v61 = vld [vmem:[%s4686_s3 + $0x380] sm:$0xff]   ;;  %v3579_v62 = vld [vmem:[%s4686_s3 + $0x3c8] sm:$0xff]  }
 0x308   : > { %2451 = vmatprep.mubr.bf16.mxu0 %v3671_v8  ;;  %2492 = vmatprep.mubr.bf16.mxu1 %v3671_v8  ;;  %v3196_v18 = vcombine.high %v2218_v13, %v2220_v14  ;;  %v2222_v8 = vld [vmem:[%s4684_s1 + $0x238] sm:$0xff]  ;;  %v3195_v23 = vcombine.low %v2218_v13, %v2220_v14  ;;  %v3581_v0 = vld [vmem:[%s4686_s3 + $0x388] sm:$0xff]   ;;  %v3592_v13 = vld [vmem:[%s4686_s3 + $0x320] sm:$0xff]  }
 0x309   : > { %v3200_v25 = vcombine.high %v2222_v8, %v2224_v21  ;;  %v3199_v33 = vcombine.low %v2222_v8, %v2224_v21  ;;  %v3593_v14 = vld [vmem:[%s4686_s3 + $0x3a0] sm:$0xff]   ;;  %v3600_v8 = vld [vmem:[%s4686_s3 + $0x330] sm:$0xff]  }
 0x30a   : > { %2422 = vmatpush1.bf16.msra.mxu0 %v3185_v7  ;;  %2463 = vmatpush1.bf16.msra.mxu1 %v3187_v9  ;;  %v3586_v7 = vld [vmem:[%s4686_s3 + $0x358] sm:$0xff]   ;;  %v3601_v21 = vld [vmem:[%s4686_s3 + $0x3b0] sm:$0xff]  }
 0x30b   : > { %2423 = vmatprep.subr.bf16.mxu0 %v3190_v10  ;;  %2464 = vmatprep.subr.bf16.mxu1 %v3192_v11  ;;  %v3587_v9 = vld [vmem:[%s4686_s3 + $0x3d8] sm:$0xff]  }
 0x30c   : > { %v3588_v10 = vld [vmem:[%s4686_s3 + $0x318] sm:$0xff]  }
 0x30d   : > { %v3589_v11 = vld [vmem:[%s4686_s3 + $0x398] sm:$0xff]  }
 0x30e   : > { %2424 = vmatpush1.bf16.msra.mxu0 %v3189_v16  ;;  %2465 = vmatpush1.bf16.msra.mxu1 %v3191_v3  ;;  %v3594_v16 = vld [vmem:[%s4686_s3 + $0x368] sm:$0xff]  }
 0x30f   : > { %2425 = vmatprep.subr.bf16.mxu0 %v3194_v17  ;;  %2466 = vmatprep.subr.bf16.mxu1 %v3196_v18  ;;  %v3595_v3 = vld [vmem:[%s4686_s3 + $0x3e8] sm:$0xff]  }
 0x310   : > { %v3596_v17 = vld [vmem:[%s4686_s3 + $0x328] sm:$0xff]  }
 0x311   : > { %v3597_v18 = vld [vmem:[%s4686_s3 + $0x3a8] sm:$0xff]  }
 0x312   : > { %2426 = vmatpush1.bf16.msra.mxu0 %v3193_v22  ;;  %2467 = vmatpush1.bf16.msra.mxu1 %v3195_v23  ;;  %v3602_v22 = vld [vmem:[%s4686_s3 + $0x378] sm:$0xff]  }
 0x313   : > { %2427 = vmatprep.subr.bf16.mxu0 %v3198_v24  ;;  %2468 = vmatprep.subr.bf16.mxu1 %v3200_v25  ;;  %v3603_v23 = vld [vmem:[%s4686_s3 + $0x3f8] sm:$0xff]  }
 0x314   : > { %v3604_v24 = vld [vmem:[%s4686_s3 + $0x338] sm:$0xff]  }
 0x315   : > { %v3605_v25 = vld [vmem:[%s4686_s3 + $0x3b8] sm:$0xff]  }
 0x316   : > { %2428 = vmatpush1.bf16.msra.mxu0 %v3197_v32  ;;  %2469 = vmatpush1.bf16.msra.mxu1 %v3199_v33 }
 0x317   : > { %2429 = vmatprep.subr.bf16.mxu0 %v3202_v34  ;;  %2470 = vmatprep.subr.bf16.mxu1 %v3204_v35 }
 0x31a   : > { %2430 = vmatpush1.bf16.msra.mxu0 %v3201_v39  ;;  %2471 = vmatpush1.bf16.msra.mxu1 %v3203_v40  ;;  %v2237_v39 = vld [vmem:[%s4685_s2 + $0xc] sm:$0xf] }
 0x31b   : > { %2431 = vmatprep.subr.bf16.mxu0 %v3206_v41  ;;  %2472 = vmatprep.subr.bf16.mxu1 %v3208_v42  ;;  %v2242_v40 = vrot.slane %v2237_v39, %v3973_v45  ;;  %v2250_v41 = vrot.slane %v2237_v39, %v3978_v47  ;;  %v2246_v42 = vrot.slane %v2237_v39, %v3980_v48 }
 0x31c   : > { %v2254_v44 = vrot.slane %v2237_v39, %v3982_v49 }
 0x31e   : > { %2432 = vmatpush1.bf16.msra.mxu0 %v3205_v52  ;;  %2473 = vmatpush1.bf16.msra.mxu1 %v3207_v53 }
 0x31f   : > { %2433 = vmatprep.subr.bf16.mxu0 %v3210_v54  ;;  %2474 = vmatprep.subr.bf16.mxu1 %v3212_v55 }
 0x322   : > { %2434 = vmatpush1.bf16.msra.mxu0 %v3209_v56  ;;  %2475 = vmatpush1.bf16.msra.mxu1 %v3211_v57 }
 0x323   : > { %3393 = vmatprep.subr.bf16.mxu0 %v3574_v58  ;;  %3415 = vmatprep.subr.bf16.mxu1 %v3575_v59 }
 0x325   : > { %2452 = vmatmul.mubr.bf16.vlgmr.msra.gmra.mrb[24].mxu0 %v4301_v31  ;;  %2493 = vmatmul.mubr.bf16.vlgmr.msra.gmra.mrb[24].mxu1 %v4301_v31  ;;  %v3578_v31 = vld [vmem:[%s4686_s3 + $0x348] sm:$0xff]  }
 0x326   : > { %3394 = vmatpush3.bf16.msra.mxu0 %v3576_v60  ;;  %3416 = vmatpush3.bf16.msra.mxu1 %v3577_v61 }
 0x327   : > { %3395 = vmatprep.subr.bf16.mxu0 %v3578_v31  ;;  %3417 = vmatprep.subr.bf16.mxu1 %v3579_v62 }
 0x32a   : > { %3396 = vmatpush3.bf16.msra.mxu0 %v3580_v63  ;;  %3418 = vmatpush3.bf16.msra.mxu1 %v3581_v0 }
 0x32b   : > { %3397 = vmatprep.subr.bf16.mxu0 %v3582_v1  ;;  %3419 = vmatprep.subr.bf16.mxu1 %v3583_v2 }
 0x32e   : > { %3398 = vmatpush3.bf16.msra.mxu0 %v3584_v5  ;;  %3420 = vmatpush3.bf16.msra.mxu1 %v3585_v6 }
 0x32f   : > { %3399 = vmatprep.subr.bf16.mxu0 %v3586_v7  ;;  %3421 = vmatprep.subr.bf16.mxu1 %v3587_v9 }
 0x332   : > { %3400 = vmatpush3.bf16.msra.mxu0 %v3588_v10  ;;  %3422 = vmatpush3.bf16.msra.mxu1 %v3589_v11 }
 0x333   : > { %3401 = vmatprep.subr.bf16.mxu0 %v3590_v12  ;;  %3423 = vmatprep.subr.bf16.mxu1 %v3591_v15 }
 0x336   : > { %3402 = vmatpush3.bf16.msra.mxu0 %v3592_v13  ;;  %3424 = vmatpush3.bf16.msra.mxu1 %v3593_v14 }
 0x337   : > { %3403 = vmatprep.subr.bf16.mxu0 %v3594_v16  ;;  %3425 = vmatprep.subr.bf16.mxu1 %v3595_v3 }
 0x33a   : > { %3404 = vmatpush3.bf16.msra.mxu0 %v3596_v17  ;;  %3426 = vmatpush3.bf16.msra.mxu1 %v3597_v18 }
 0x33b   : > { %3405 = vmatprep.subr.bf16.mxu0 %v3598_v19  ;;  %3427 = vmatprep.subr.bf16.mxu1 %v3599_v20 }
 0x33e   : > { %3406 = vmatpush3.bf16.msra.mxu0 %v3600_v8  ;;  %3428 = vmatpush3.bf16.msra.mxu1 %v3601_v21 }
 0x33f   : > { %3407 = vmatprep.subr.bf16.mxu0 %v3602_v22  ;;  %3429 = vmatprep.subr.bf16.mxu1 %v3603_v23 }
 0x342   : > { %3408 = vmatpush3.bf16.msra.mxu0 %v3604_v24  ;;  %3430 = vmatpush3.bf16.msra.mxu1 %v3605_v25 }
 0x3d8   : > { %v3365_v27 = vpop.f32.mrb[20].mxu0  ;;  %v3387_v28 = vpop.f32.mrb[20].mxu1 }
 0x3d9   : > { %v3366_v29 = vpop.f32.mrb[21].mxu0  ;;  %v3388_v32 = vpop.f32.mrb[21].mxu1 }
 0x3da   : > { %v3367_v30 = vadd.f32 %v3366_v29, %v3365_v27  ;;  %v3368_v33 = vpop.f32.mrb[22].mxu0  ;;  %v3389_v34 = vadd.f32 %v3388_v32, %v3387_v28  ;;  %v3390_v35 = vpop.f32.mrb[22].mxu1 }
 0x3db   : > { %v3369_v36 = vpop.f32.mrb[23].mxu0  ;;  %v3391_v37 = vpop.f32.mrb[23].mxu1 }
 0x3dc   : > { %v2198_v38 = vadd.f32 %v3389_v34, %v3367_v30 }
 0x3de   : > { %v2203_v4 = vadd.f32 %v2198_v38, %v4430_v26 }
 0x3f8   : > { %v2453_v46 = vpop.f32.mrb[24].mxu0  ;;  %v2494_v51 = vpop.f32.mrb[24].mxu1 }
 0x3f9   : > { %v2454_v50 = vadd.f32 %v2453_v46, %v2242_v40  ;;  %v2455_v52 = vpop.f32.mrb[25].mxu0  ;;  %v2495_v53 = vadd.f32 %v2494_v51, %v2250_v41  ;;  %v2496_v55 = vpop.f32.mrb[25].mxu1 }
 0x3fa   : > { %v2456_v54 = vadd.f32 %v2455_v52, %v2246_v42  ;;  %v2457_v26 = vpop.f32.mrb[26].mxu0  ;;  %v2497_v57 = vadd.f32 %v2496_v55, %v2254_v44  ;;  %v2498_v58 = vpop.f32.mrb[26].mxu1 }
 0x3fb   : > { %v2501_v56 = vmax.f32 %v2454_v50, 0.0  ;;  %v2458_v45 = vpop.f32.mrb[27].mxu0  ;;  %v2503_v59 = vmax.f32 %v2495_v53, 0.0  ;;  %v2499_v60 = vpop.f32.mrb[27].mxu1 }
 0x3fc   : > { %v2502_v47 = vmax.f32 %v2456_v54, 0.0  ;;  %v2504_v48 = vmax.f32 %v2497_v57, 0.0 }
 0x3fd   : > { %v2505_v31 = vpack.c.bf16 %v2501_v56, %v2501_v56  ;;  %v2507_v0 = vpack.c.bf16 %v2503_v59, %v2503_v59 }
 0x3fe   : > { %v2506_v61 = vpack.c.bf16 %v2502_v47, %v2502_v47  ;;  %v3258_v49 = vpack.c.bf16 %v2502_v47, %v2501_v56  ;;  %v2508_v62 = vpack.c.bf16 %v2504_v48, %v2504_v48  ;;  %v3259_v63 = vpack.c.bf16 %v2504_v48, %v2503_v59 }
 0x400   : > { %2521 = vst [vmem:[%s4003_s10 + $0x30] sm:$0xff] %v3258_v49  ;;  %2812 = vmatprep.mubr.bf16.mxu0 %v2506_v61  ;;  %2522 = vst [vmem:[%s4003_s10 + $0x38] sm:$0xff] %v3259_v63  ;;  %2852 = vmatprep.mubr.bf16.mxu1 %v2508_v62 }
 0x401   : > { %2813 = vmatmul.mubr.bf16.vlgmr.msra.gmra.mrb[28].mxu0 %v2505_v31  ;;  %2853 = vmatmul.mubr.bf16.vlgmr.msra.gmra.mrb[28].mxu1 %v2507_v0 }
 0x4d4   : > { %v3409_v1 = vpop.f32.mrb[28].mxu0  ;;  %v3431_v2 = vpop.f32.mrb[28].mxu1 }
 0x4d5   : > { %v3410_v5 = vpop.f32.mrb[29].mxu0  ;;  %v3432_v7 = vpop.f32.mrb[29].mxu1 }
 0x4d6   : > { %v3411_v6 = vadd.f32 %v3410_v5, %v3409_v1  ;;  %v3412_v9 = vpop.f32.mrb[30].mxu0  ;;  %v3433_v10 = vadd.f32 %v3432_v7, %v3431_v2  ;;  %v3434_v11 = vpop.f32.mrb[30].mxu1 }
 0x4d7   : > { %v3413_v12 = vpop.f32.mrb[31].mxu0  ;;  %v3435_v15 = vpop.f32.mrb[31].mxu1 }
 0x4d8   : > { %v2855_v13 = vadd.f32 %v3433_v10, %v3411_v6 }
 0x4da   : > { %v2860_v14 = vadd.f32 %v2855_v13, %v2203_v4 }
 0x4dc   : > { %v2863_v16 = vmax.f32 %v2860_v14, 0.0 }
 0x4de   : > { %2864 = vadd.xlane.f32.xlu0 %v2863_v16 }
 0x4df   : > { %3620 = shalt.err (!%p3617_p3)
}
 0x4e0   : > { %s3621_s22 = scalar_lea.hbm %s4640_s17, 1024  ;;  %s3625_s30 = scalar_lea.hbm %s4687_s4, 2048 }
 0x4e1   : > { %p3622_p4 = scmp.ne.s32.totalorder %s4640_s17, %s3621_s22  ;;  %p3626_p9 = scmp.lt.u32.totalorder %s4640_s17, %s4687_s4 }
 0x4e2   : > { %p3627_p10 = scmp.lt.u32.totalorder %s3625_s30, %s3621_s22  ;;  %p3629_p12 = scmp.lt.u32.totalorder %s3621_s22, %s4640_s17 }
 0x4e3   : > { %p3623_p7 = pnand %p3622_p4, %p3741_p5 }
 0x4e4   : > { %p3628_p11 = por %p3627_p10, %p3626_p9 }
 0x4e5   : > { %p3624_p8 = pneg %p3623_p7 }
 0x4e6   : > { %p3630_p13 = por %p3629_p12, %p3628_p11 }
 0x4e8   : > { %p3631_p0 = pnand %p3630_p13, %p3624_p8 }
 0x4ea   : > { %3634 = shalt.err (!%p3631_p0)
}
 0x4eb   : > { %3437 = dma.vmem_to_hbm [thread:$0]  (%p3741_p5), %s2891_s11, 1024, %s4640_s17, %s2872_s23   ;;  %v2867_v3 = vand.u32 127, %v268_v43 }
 0x4ec   : > { %s2982_s8 = sshll.u32 %s3842_s15, 3 }
 0x4ed   : > { %vm2868_vm0 = vcmp.eq.s32.totalorder %v2867_v3, 4  ;;  %s230_s25 = scalar_lea.vmem %s4688_s5, %s2982_s8 }
 0x56b   : > { %v2865_v17 = vpop.xlane.xlu0 %2864 }
 0x56c   : > { %v2869_v18 = vsel %vm2868_vm0, %v2865_v17, %v2863_v16 }
 0x56d   : > { %2870 = vst [vmem:[%s230_s25] sm:$0xff] %v2869_v18 }
 0x56e PF: > { %p3443_p1 = scmp.ge.s32.totalorder %s3669_s21, 2  ;;  %s2905_s28 = sand.u32 1, %s3657_s18  }
 0x56f   : > { %s2906_s11 = scalar_lea.sflag [#allocation3], %s2905_s28 }
 0x570   : > { %p3440_p2 = pnand %p3443_p1, %p3745_p6 }
 0x572   : > { %3652 = dma.done.wait (!%p3440_p2), %s2906_s11, 1024  }
 0x573   : > { %3654 = vsyncadd (!%p3440_p2), %s2906_s11, 4294966272  ;;  %p16_p5 = scmp.ge.s32.totalorder %s3728_s24, 4   ;;  %s4691_s18 = smov %s3661_s19 }
 0x574   : > { %s4692_s19 = smov %s3665_s20  ;;  %s4693_s20 = smov %s3739_s27 }
 0x575   : > { %s4694_s21 = smov %s3728_s24  ;;  %18 = sbr.rel (!%p16_p5) target bundleno = 3 (0x3), region = 83 }
 0x57c   :  { %2918 = vsyncpa [#allocation3], 1 }
 0x57d   :  { %2920 = vsyncpa [#allocation3 + $0x1], 1 }

</bundles_post_ra>
